<compile_context>
chip_gen: v6e
topology: v6e:2x2x1
jax: 0.10.0
libtpu: 0.0.40
codegen_flags: <defaults>
</compile_context>

<pallas_src>
import jax
import jax.numpy as jnp
from jax import lax
from jax.experimental import pallas as pl
from jax.experimental.pallas import tpu as pltpu

# ------------------------- small synthetic config ---------------------------
B = 2            # batch
S = 16           # table sequence length
H = 32           # hidden size
NH = 2           # attention heads
HD = H // NH     # head dim
FFN = 64         # feed-forward inner size
LAYERS = 2       # encoder layers
VOCAB = 100      # token vocab
MAG, PRE, TOP, LOW = 12, 12, 12, 12   # numeric-feature vocabs
ORDER = 8        # in-cell token-order vocab
ROWS, COLS = 16, 16                   # row / column position vocabs
NODE, DEPTH = 16, 4                   # tree-position vocab / tree depth
FMT = 11         # number of cell-format features
SKV = 32         # formula sketch vocab
L = 8            # sketch length
NEG = -1e4       # additive attention mask value

BS = B * S       # folded batch*seq rows
BL = B * L       # folded batch*sketch rows
OUT_LANES = 128  # lane-dense output width
OUT_ROWS = 24    # >= BL + B, multiple of 8 (rows 0..BL-1: sketch, BL..BL+B-1: range)

# packed-slab layouts
MASK_ROWS = 56              # >= BS + BL + B + 1, multiple of 8
SEL_ROWS = 40               # >= BL + B + BL, multiple of 8
SEL_COLS = max(BS, H)       # selector cols (BS) and embedding cols (H); both 32 here
R_ENC, R_HEAD, R_CANDI, R_HBSK = 0, BS, BS + BL, BS + BL + B

assert SKV <= OUT_LANES and BS <= OUT_LANES and BL + B <= OUT_ROWS
assert BS + BL + B + 1 <= MASK_ROWS and BL + B + BL <= SEL_ROWS
assert 4 * H <= OUT_LANES and H <= SEL_COLS


# ------------------------------ shared math ---------------------------------
def _layernorm(x, g, b, eps=1e-6):
    mu = jnp.mean(x, axis=-1, keepdims=True)
    var = jnp.mean((x - mu) ** 2, axis=-1, keepdims=True)
    return (x - mu) * lax.rsqrt(var + eps) * g + b


def _gelu(x):
    # tanh approximation.  TODO(synk): TUTA uses erf-based GELU.
    return 0.5 * x * (1.0 + jnp.tanh(0.7978845608028654 * (x + 0.044715 * x * x * x)))


def _softmax_lastdim(s):
    s = s - jnp.max(s, axis=-1, keepdims=True)
    p = jnp.exp(s)
    return p / jnp.sum(p, axis=-1, keepdims=True)


def _dot(a, b):
    return jnp.dot(a, b, preferred_element_type=jnp.float32)


def _dot_t(a, b):
    # a @ b.T without materializing the transpose: contract the last dims.
    return lax.dot_general(a, b, (((1,), (1,)), ((), ())),
                           preferred_element_type=jnp.float32)


# --------------------- fused Pallas kernel (encoder + FP head) ---------------
def fptuta_fused_kernel(x_ref, mask_ref, sel_ref, wqkvo_ref, lbias_ref,
                        wffn_ref, hw_ref, out_ref):
    x = x_ref[...]                                        # (BS, H) f32
    enc_bias = mask_ref[R_ENC:R_ENC + BS, 0:BS]           # (BS, BS)
    head_bias = mask_ref[R_HEAD:R_HEAD + BL, 0:BS]        # (BL, BS)
    candi_bias = mask_ref[R_CANDI:R_CANDI + B, 0:BS]      # (B, BS)
    hbsk = mask_ref[R_HBSK:R_HBSK + 1, 0:OUT_LANES]       # (1, 128)
    scale = 1.0 / (HD ** 0.5)

    # -------------------- backbone encoder: all layers fused -----------------
    for l in range(LAYERS):                               # static loop over layers
        wqkv = wqkvo_ref[l, :, 0:3 * H]                   # (H, 3H) fused q/k/v weight
        wo = wqkvo_ref[l, :, 3 * H:4 * H]                 # (H, H)
        bqkv = lbias_ref[l, 0:1, 0:3 * H]
        bo = lbias_ref[l, 1:2, 0:H]
        g1 = lbias_ref[l, 2:3, 0:H]
        b1 = lbias_ref[l, 3:4, 0:H]
        bf1 = lbias_ref[l, 4:5, 0:FFN]
        bf2 = lbias_ref[l, 5:6, 0:H]
        g2 = lbias_ref[l, 6:7, 0:H]
        b2 = lbias_ref[l, 7:8, 0:H]
        w1 = wffn_ref[l, 0:H, 0:FFN]                      # (H, FFN)
        w2 = wffn_ref[l, H:H + FFN, 0:H]                  # (FFN, H)

        qkv = _dot(x, wqkv) + bqkv                        # (BS, 3H) single fused matmul
        ctx_heads = []
        for h in range(NH):                               # static loop over heads
            qh = qkv[:, h * HD:(h + 1) * HD]              # (BS, HD)
            kh = qkv[:, H + h * HD:H + (h + 1) * HD]
            vh = qkv[:, 2 * H + h * HD:2 * H + (h + 1) * HD]
            s = _dot_t(qh, kh) * scale + enc_bias         # (BS, BS), no kh.T copy
            p = _softmax_lastdim(s)
            ctx_heads.append(_dot(p, vh))                 # (BS, HD)
        ctx = jnp.concatenate(ctx_heads, axis=-1)         # (BS, H)
        attn = _dot(ctx, wo) + bo                         # single output projection
        h1 = _layernorm(attn + x, g1, b1)                 # post-LN (BERT/TUTA)
        ff = _gelu(_dot(h1, w1) + bf1)
        ff = _dot(ff, w2) + bf2
        x = _layernorm(ff + h1, g2, b2)

    enc = x                                               # (BS, H) encoded table states

    # ------------------------------ FP head ----------------------------------
    sel_dec = sel_ref[0:BL, 0:BS]                         # (BL, BS) one-hot selectors
    sel_fc = sel_ref[BL:BL + B, 0:BS]                     # (B, BS)
    skemb = sel_ref[BL + B:BL + B + BL, 0:H]              # (BL, H) sketch embeddings

    hwq = hw_ref[:, 0:H]
    hwk = hw_ref[:, H:2 * H]
    hwv = hw_ref[:, 2 * H:3 * H]
    hwr = hw_ref[:, 3 * H:4 * H]
    hwsk = hw_ref[:, 4 * H:4 * H + OUT_LANES]             # (H, 128) zero-padded vocab proj

    # one-hot selector matmuls: gather formula-cell state + broadcast over sketch
    fc = _dot(sel_fc, enc)                                # (B, H)
    dec_in = skemb + _dot(sel_dec, enc)                   # (BL, H)

    # sketch-decoder cross-attention over encoded states
    q = _dot(dec_in, hwq)                                 # (BL, H)
    k = _dot(enc, hwk)                                    # (BS, H)
    v = _dot(enc, hwv)                                    # (BS, H)
    s = _dot_t(q, k) * (1.0 / (H ** 0.5)) + head_bias     # (BL, BS)
    p = _softmax_lastdim(s)
    ctx = _dot(p, v)                                      # (BL, H)

    # sketch-vocab logits (wsk zero-padded to 128 cols -> full-lane-width result)
    sk = _dot(ctx + dec_in, hwsk) + hbsk                  # (BL, 128)

    # pointer-style range scores over candidate cell tokens
    rq = _dot(fc, hwr)                                    # (B, H)
    rng = _dot_t(rq, enc) + candi_bias                    # (B, BS), no enc.T copy

    # assemble packed, lane-dense output slab in registers -> single full store
    rng_pad = jnp.concatenate(
        [rng, jnp.zeros((B, OUT_LANES - BS), jnp.float32)], axis=-1)   # (B, 128)
    tail = jnp.zeros((OUT_ROWS - BL - B, OUT_LANES), jnp.float32)
    out_ref[...] = jnp.concatenate([sk, rng_pad, tail], axis=0)


def _full_spec(shape):
    n = len(shape)
    return pl.BlockSpec(shape, lambda i, n=n: (0,) * n)


def fptuta_fused(inputs):
    in_specs = [_full_spec(a.shape) for a in inputs]
    return pl.pallas_call(
        fptuta_fused_kernel,
        out_shape=jax.ShapeDtypeStruct((OUT_ROWS, OUT_LANES), jnp.float32),
        grid=(1,),
        in_specs=in_specs,
        out_specs=_full_spec((OUT_ROWS, OUT_LANES)),
        compiler_params=pltpu.CompilerParams(dimension_semantics=("arbitrary",)),
    )(*inputs)


# ----------------------------- parameters ------------------------------------
def init_params(key):
    def nrm(k, shape, scale=0.02):
        return scale * jax.random.normal(k, shape, jnp.float32)

    keys = iter(jax.random.split(key, 64))
    p = {
        "tok_emb": nrm(next(keys), (VOCAB, H)),
        "mag_emb": nrm(next(keys), (MAG, H)),
        "pre_emb": nrm(next(keys), (PRE, H)),
        "top_emb": nrm(next(keys), (TOP, H)),
        "low_emb": nrm(next(keys), (LOW, H)),
        "ord_emb": nrm(next(keys), (ORDER, H)),
        "row_emb": nrm(next(keys), (ROWS, H)),
        "col_emb": nrm(next(keys), (COLS, H)),
        "tree_top_emb": nrm(next(keys), (NODE, H)),
        "tree_left_emb": nrm(next(keys), (NODE, H)),
        "fmt_w": nrm(next(keys), (FMT, H)),
        "fmt_b": jnp.zeros((H,), jnp.float32),
        "emb_g": jnp.ones((H,), jnp.float32),
        "emb_b": jnp.zeros((H,), jnp.float32),
        "sk_tok_emb": nrm(next(keys), (SKV, H)),
        "layers": [],
        "head": {
            "wq": nrm(next(keys), (H, H)), "wk": nrm(next(keys), (H, H)),
            "wv": nrm(next(keys), (H, H)), "wsk": nrm(next(keys), (H, SKV)),
            "bsk": jnp.zeros((1, SKV), jnp.float32), "wr": nrm(next(keys), (H, H)),
        },
    }
    for _ in range(LAYERS):
        p["layers"].append({
            "wq": nrm(next(keys), (H, H)), "bq": jnp.zeros((1, H), jnp.float32),
            "wk": nrm(next(keys), (H, H)), "bk": jnp.zeros((1, H), jnp.float32),
            "wv": nrm(next(keys), (H, H)), "bv": jnp.zeros((1, H), jnp.float32),
            "wo": nrm(next(keys), (H, H)), "bo": jnp.zeros((1, H), jnp.float32),
            "g1": jnp.ones((1, H), jnp.float32), "b1": jnp.zeros((1, H), jnp.float32),
            "w1": nrm(next(keys), (H, FFN)), "bf1": jnp.zeros((1, FFN), jnp.float32),
            "w2": nrm(next(keys), (FFN, H)), "bf2": jnp.zeros((1, H), jnp.float32),
            "g2": jnp.ones((1, H), jnp.float32), "b2": jnp.zeros((1, H), jnp.float32),
        })
    return p


def _pad_row(v, width=OUT_LANES):
    # (1, n) -> (1, width) zero-padded
    return jnp.zeros((1, width), jnp.float32).at[:, :v.shape[1]].set(v)


def _pack_layer_weights(layers):
    wqkvo, wffn, lbias = [], [], []
    for lp in layers:
        wqkvo.append(jnp.concatenate([lp["wq"], lp["wk"], lp["wv"], lp["wo"]], axis=1))
        w2_pad = jnp.zeros((FFN, FFN), jnp.float32).at[:, :H].set(lp["w2"])
        wffn.append(jnp.concatenate([lp["w1"], w2_pad], axis=0))       # (H+FFN, FFN)
        bqkv = jnp.concatenate([lp["bq"], lp["bk"], lp["bv"]], axis=1)  # (1, 3H)
        lbias.append(jnp.concatenate(
            [_pad_row(bqkv), _pad_row(lp["bo"]), _pad_row(lp["g1"]), _pad_row(lp["b1"]),
             _pad_row(lp["bf1"]), _pad_row(lp["bf2"]), _pad_row(lp["g2"]),
             _pad_row(lp["b2"])], axis=0))                               # (8, 128)
    return (jnp.stack(wqkvo, axis=0),      # (LAYERS, H, 4H)
            jnp.stack(wffn, axis=0),       # (LAYERS, H+FFN, FFN)
            jnp.stack(lbias, axis=0))      # (LAYERS, 8, 128)


def _pack_head_weights(head):
    wsk_pad = jnp.zeros((H, OUT_LANES), jnp.float32).at[:, :SKV].set(head["wsk"])
    hw = jnp.concatenate([head["wq"], head["wk"], head["wv"], head["wr"], wsk_pad],
                         axis=1)                                         # (H, 4H+128)
    bsk_pad = _pad_row(head["bsk"])                                      # (1, 128)
    return hw, bsk_pad


# ------------------------------ forward pass ---------------------------------
def fptuta_forward(params, token_id, num_mag, num_pre, num_top, num_low,
                   token_order, pos_row, pos_col, pos_top, pos_left,
                   format_vec, indicator, formula_label, src_sketch, tgt_sketch,
                   candi_cell_token_mask, range_label, range_map):
    # ---------------- backbone embeddings (gathers: plain-JAX glue) ----------
    emb = (params["tok_emb"][token_id]
           + params["mag_emb"][num_mag] + params["pre_emb"][num_pre]
           + params["top_emb"][num_top] + params["low_emb"][num_low]
           + params["ord_emb"][token_order]
           + params["row_emb"][pos_row] + params["col_emb"][pos_col]
           + jnp.sum(params["tree_top_emb"][pos_top], axis=2)
           + jnp.sum(params["tree_left_emb"][pos_left], axis=2)
           + jnp.einsum("bsf,fh->bsh", format_vec, params["fmt_w"]) + params["fmt_b"])
    emb = _layernorm(emb, params["emb_g"], params["emb_b"])
    x0 = emb.reshape(BS, H).astype(jnp.float32)

    # additive key-padding mask + block-diagonal batch isolation (batch is folded)
    # TODO(synk): TUTA additionally restricts attention with a tree-visibility matrix.
    key_flat = jnp.where(indicator > 0, 0.0, NEG).astype(jnp.float32).reshape(BS)
    block_b = jnp.where(jnp.eye(B, dtype=bool), 0.0, NEG).astype(jnp.float32)
    enc_bias = jnp.kron(block_b, jnp.ones((S, S), jnp.float32)) + key_flat[None, :]
    head_bias = jnp.kron(block_b, jnp.ones((L, S), jnp.float32)) + key_flat[None, :]
    candi_flat = jnp.where(candi_cell_token_mask > 0, 0.0, NEG).astype(jnp.float32).reshape(BS)
    candi_bias = jnp.kron(block_b, jnp.ones((1, S), jnp.float32)) + candi_flat[None, :]

    # formula-cell selectors (first formula_label==1 position per row, as in torch
    # view(...)[:, 0, :]); one-hot matmul inside the kernel replaces the XLA gather
    first_idx = jnp.argmax((formula_label == 1).astype(jnp.int32), axis=1)   # (B,)
    flat_idx = jnp.arange(B) * S + first_idx
    sel_fc = jax.nn.one_hot(flat_idx, BS, dtype=jnp.float32)                 # (B, BS)
    sel_dec = jnp.repeat(sel_fc, L, axis=0)                                  # (BL, BS)

    sk_emb = params["sk_tok_emb"][src_sketch].reshape(BL, H).astype(jnp.float32)

    wqkvo, wffn, lbias = _pack_layer_weights(params["layers"])
    hw, bsk_pad = _pack_head_weights(params["head"])

    # one packed mask / bias slab (56, 128)
    mask = jnp.zeros((MASK_ROWS, OUT_LANES), jnp.float32)
    mask = mask.at[R_ENC:R_ENC + BS, 0:BS].set(enc_bias)
    mask = mask.at[R_HEAD:R_HEAD + BL, 0:BS].set(head_bias)
    mask = mask.at[R_CANDI:R_CANDI + B, 0:BS].set(candi_bias)
    mask = mask.at[R_HBSK:R_HBSK + 1, 0:OUT_LANES].set(bsk_pad)

    # one packed selector / sketch-embedding slab (40, 32)
    sel = jnp.zeros((SEL_ROWS, SEL_COLS), jnp.float32)
    sel = sel.at[0:BL, 0:BS].set(sel_dec)
    sel = sel.at[BL:BL + B, 0:BS].set(sel_fc)
    sel = sel.at[BL + B:BL + B + BL, 0:H].set(sk_emb)

    inputs = [x0, mask, sel, wqkvo, lbias, wffn, hw]
    slab = fptuta_fused(inputs)                                    # (24, 128)

    sketch_logits = slab[:BL, :SKV].reshape(B, L, SKV)
    range_logits = slab[BL:BL + B, :BS].reshape(B, B, S)[jnp.arange(B), jnp.arange(B)]

    # ---------------- losses (glue) -------------------------------------------
    # TODO(synk): fortap's FPHead uses an LSTM sketch decoder with teacher forcing and
    # a per-<RANGE>-slot pointer loss driven by range_map; approximated here with
    # token-level cross-entropies. range_map is accepted but unused.
    sk_logp = jax.nn.log_softmax(sketch_logits, axis=-1)
    sketch_loss = -jnp.mean(
        jnp.take_along_axis(sk_logp, tgt_sketch[..., None], axis=-1)[..., 0])
    rng_logp = jax.nn.log_softmax(range_logits, axis=-1)
    rl = range_label.astype(jnp.float32)
    denom = jnp.maximum(jnp.sum(rl, axis=-1), 1.0)
    range_loss = jnp.mean(-jnp.sum(rl * rng_logp, axis=-1) / denom)

    return sketch_logits, range_logits, sketch_loss, range_loss


# ----------------------------------- main -------------------------------------
if __name__ == "__main__":
    key = jax.random.PRNGKey(0)
    pkey, dkey = jax.random.split(key)
    params = init_params(pkey)

    ks = jax.random.split(dkey, 16)
    token_id = jax.random.randint(ks[0], (B, S), 0, VOCAB)
    num_mag = jax.random.randint(ks[1], (B, S), 0, MAG)
    num_pre = jax.random.randint(ks[2], (B, S), 0, PRE)
    num_top = jax.random.randint(ks[3], (B, S), 0, TOP)
    num_low = jax.random.randint(ks[4], (B, S), 0, LOW)
    token_order = jax.random.randint(ks[5], (B, S), 0, ORDER)
    pos_row = jax.random.randint(ks[6], (B, S), 0, ROWS)
    pos_col = jax.random.randint(ks[7], (B, S), 0, COLS)
    pos_top = jax.random.randint(ks[8], (B, S, DEPTH), 0, NODE)
    pos_left = jax.random.randint(ks[9], (B, S, DEPTH), 0, NODE)
    format_vec = jax.random.uniform(ks[10], (B, S, FMT), jnp.float32)
    indicator = jnp.where(jnp.arange(S)[None, :] < S - 3, 1, 0).astype(jnp.int32) \
        * jnp.ones((B, 1), jnp.int32)
    formula_label = (jnp.zeros((B, S), jnp.int32)
                     .at[0, 3].set(1).at[0, 7].set(1)
                     .at[1, 2].set(1).at[1, 5].set(1))      # equal count per batch row
    src_sketch = jax.random.randint(ks[11], (B, L), 0, SKV)
    tgt_sketch = jax.random.randint(ks[12], (B, L), 0, SKV)
    candi_cell_token_mask = jnp.zeros((B, S), jnp.int32).at[:, 4:10].set(1)
    range_label = jnp.zeros((B, S), jnp.int32).at[0, 5].set(1).at[1, 6].set(1)
    range_map = jnp.zeros((B, S), jnp.int32)

    fwd = jax.jit(fptuta_forward)
    out = fwd(params, token_id, num_mag, num_pre, num_top, num_low, token_order,
              pos_row, pos_col, pos_top, pos_left, format_vec, indicator,
              formula_label, src_sketch, tgt_sketch, candi_cell_token_mask,
              range_label, range_map)
    jax.block_until_ready(out)

    sketch_logits, range_logits, sketch_loss, range_loss = out
    assert sketch_logits.shape == (B, L, SKV)
    assert range_logits.shape == (B, S)
    assert jnp.isfinite(sketch_loss) and jnp.isfinite(range_loss)
    print("KERNEL_OK")
</pallas_src>

<mosaic_0001>
module attributes {stable_mosaic.version = 11 : i64} {
  func.func @fptuta_fused_kernel(%arg0: i32, %arg1: memref<32x32xf32, #tpu.memory_space<vmem>>, %arg2: memref<56x128xf32, #tpu.memory_space<vmem>>, %arg3: memref<40x32xf32, #tpu.memory_space<vmem>>, %arg4: memref<2x32x128xf32, #tpu.memory_space<vmem>>, %arg5: memref<2x8x128xf32, #tpu.memory_space<vmem>>, %arg6: memref<2x96x64xf32, #tpu.memory_space<vmem>>, %arg7: memref<32x256xf32, #tpu.memory_space<vmem>>, %arg8: memref<24x128xf32, #tpu.memory_space<vmem>>) attributes {dimension_semantics = [#tpu.dimension_semantics<arbitrary>], iteration_bounds = array<i64: 1>, scalar_prefetch = 0 : i64, scratch_operands = 0 : i64, tpu.core_type = #tpu.core_type<tc>, window_params = [{pipeline_mode = #tpu.pipeline_mode<synchronous>, transform_indices = @transform_0, window_bounds = array<i64: 32, 32>}, {pipeline_mode = #tpu.pipeline_mode<synchronous>, transform_indices = @transform_1, window_bounds = array<i64: 56, 128>}, {pipeline_mode = #tpu.pipeline_mode<synchronous>, transform_indices = @transform_2, window_bounds = array<i64: 40, 32>}, {pipeline_mode = #tpu.pipeline_mode<synchronous>, transform_indices = @transform_3, window_bounds = array<i64: 2, 32, 128>}, {pipeline_mode = #tpu.pipeline_mode<synchronous>, transform_indices = @transform_4, window_bounds = array<i64: 2, 8, 128>}, {pipeline_mode = #tpu.pipeline_mode<synchronous>, transform_indices = @transform_5, window_bounds = array<i64: 2, 96, 64>}, {pipeline_mode = #tpu.pipeline_mode<synchronous>, transform_indices = @transform_6, window_bounds = array<i64: 32, 256>}, {pipeline_mode = #tpu.pipeline_mode<synchronous>, transform_indices = @transform_7, window_bounds = array<i64: 24, 128>}]} {
    %c0 = arith.constant 0 : index
    %c0_0 = arith.constant 0 : index
    %0 = vector.load %arg1[%c0, %c0_0] : memref<32x32xf32, #tpu.memory_space<vmem>>, vector<32x32xf32>
    %c0_1 = arith.constant 0 : index
    %c0_2 = arith.constant 0 : index
    %1 = vector.load %arg2[%c0_1, %c0_2] : memref<56x128xf32, #tpu.memory_space<vmem>>, vector<32x32xf32>
    %c32 = arith.constant 32 : index
    %c0_3 = arith.constant 0 : index
    %2 = vector.load %arg2[%c32, %c0_3] : memref<56x128xf32, #tpu.memory_space<vmem>>, vector<16x32xf32>
    %c48 = arith.constant 48 : index
    %c0_4 = arith.constant 0 : index
    %3 = vector.load %arg2[%c48, %c0_4] : memref<56x128xf32, #tpu.memory_space<vmem>>, vector<2x32xf32>
    %c50 = arith.constant 50 : index
    %c0_5 = arith.constant 0 : index
    %4 = vector.load %arg2[%c50, %c0_5] : memref<56x128xf32, #tpu.memory_space<vmem>>, vector<1x128xf32>
    %c0_6 = arith.constant 0 : index
    %c0_7 = arith.constant 0 : index
    %c0_8 = arith.constant 0 : index
    %5 = vector.load %arg4[%c0_6, %c0_7, %c0_8] : memref<2x32x128xf32, #tpu.memory_space<vmem>>, vector<1x32x96xf32>
    %6 = vector.shape_cast %5 : vector<1x32x96xf32> to vector<32x96xf32>
    %c0_9 = arith.constant 0 : index
    %c0_10 = arith.constant 0 : index
    %c96 = arith.constant 96 : index
    %7 = vector.load %arg4[%c0_9, %c0_10, %c96] : memref<2x32x128xf32, #tpu.memory_space<vmem>>, vector<1x32x32xf32>
    %8 = vector.shape_cast %7 : vector<1x32x32xf32> to vector<32x32xf32>
    %c0_11 = arith.constant 0 : index
    %c0_12 = arith.constant 0 : index
    %c0_13 = arith.constant 0 : index
    %9 = vector.load %arg5[%c0_11, %c0_12, %c0_13] : memref<2x8x128xf32, #tpu.memory_space<vmem>>, vector<1x1x96xf32>
    %10 = vector.shape_cast %9 : vector<1x1x96xf32> to vector<1x96xf32>
    %c0_14 = arith.constant 0 : index
    %c1 = arith.constant 1 : index
    %c0_15 = arith.constant 0 : index
    %11 = vector.load %arg5[%c0_14, %c1, %c0_15] : memref<2x8x128xf32, #tpu.memory_space<vmem>>, vector<1x1x32xf32>
    %12 = vector.shape_cast %11 : vector<1x1x32xf32> to vector<1x32xf32>
    %c0_16 = arith.constant 0 : index
    %c2 = arith.constant 2 : index
    %c0_17 = arith.constant 0 : index
    %13 = vector.load %arg5[%c0_16, %c2, %c0_17] : memref<2x8x128xf32, #tpu.memory_space<vmem>>, vector<1x1x32xf32>
    %14 = vector.shape_cast %13 : vector<1x1x32xf32> to vector<1x32xf32>
    %c0_18 = arith.constant 0 : index
    %c3 = arith.constant 3 : index
    %c0_19 = arith.constant 0 : index
    %15 = vector.load %arg5[%c0_18, %c3, %c0_19] : memref<2x8x128xf32, #tpu.memory_space<vmem>>, vector<1x1x32xf32>
    %16 = vector.shape_cast %15 : vector<1x1x32xf32> to vector<1x32xf32>
    %c0_20 = arith.constant 0 : index
    %c4 = arith.constant 4 : index
    %c0_21 = arith.constant 0 : index
    %17 = vector.load %arg5[%c0_20, %c4, %c0_21] : memref<2x8x128xf32, #tpu.memory_space<vmem>>, vector<1x1x64xf32>
    %18 = vector.shape_cast %17 : vector<1x1x64xf32> to vector<1x64xf32>
    %c0_22 = arith.constant 0 : index
    %c5 = arith.constant 5 : index
    %c0_23 = arith.constant 0 : index
    %19 = vector.load %arg5[%c0_22, %c5, %c0_23] : memref<2x8x128xf32, #tpu.memory_space<vmem>>, vector<1x1x32xf32>
    %20 = vector.shape_cast %19 : vector<1x1x32xf32> to vector<1x32xf32>
    %c0_24 = arith.constant 0 : index
    %c6 = arith.constant 6 : index
    %c0_25 = arith.constant 0 : index
    %21 = vector.load %arg5[%c0_24, %c6, %c0_25] : memref<2x8x128xf32, #tpu.memory_space<vmem>>, vector<1x1x32xf32>
    %22 = vector.shape_cast %21 : vector<1x1x32xf32> to vector<1x32xf32>
    %c0_26 = arith.constant 0 : index
    %c7 = arith.constant 7 : index
    %c0_27 = arith.constant 0 : index
    %23 = vector.load %arg5[%c0_26, %c7, %c0_27] : memref<2x8x128xf32, #tpu.memory_space<vmem>>, vector<1x1x32xf32>
    %24 = vector.shape_cast %23 : vector<1x1x32xf32> to vector<1x32xf32>
    %c0_28 = arith.constant 0 : index
    %c0_29 = arith.constant 0 : index
    %c0_30 = arith.constant 0 : index
    %25 = vector.load %arg6[%c0_28, %c0_29, %c0_30] : memref<2x96x64xf32, #tpu.memory_space<vmem>>, vector<1x32x64xf32>
    %26 = vector.shape_cast %25 : vector<1x32x64xf32> to vector<32x64xf32>
    %c0_31 = arith.constant 0 : index
    %c32_32 = arith.constant 32 : index
    %c0_33 = arith.constant 0 : index
    %27 = vector.load %arg6[%c0_31, %c32_32, %c0_33] : memref<2x96x64xf32, #tpu.memory_space<vmem>>, vector<1x64x32xf32>
    %28 = vector.shape_cast %27 : vector<1x64x32xf32> to vector<64x32xf32>
    %cst = arith.constant dense<0.000000e+00> : vector<32x96xf32>
    %29 = tpu.matmul %0, %6, %cst {dimension_numbers = #tpu.dot_dimension_numbers<[1], [0], [0], [1], [0, 0, 1, 1], [], []>} : vector<32x32xf32>, vector<32x96xf32>, vector<32x96xf32> -> vector<32x96xf32>
    %30 = vector.broadcast %10 : vector<1x96xf32> to vector<32x96xf32>
    %31 = arith.addf %29, %30 : vector<32x96xf32>
    %32 = vector.extract_strided_slice %31 {offsets = [0, 0], sizes = [32, 16], strides = [1, 1]} : vector<32x96xf32> to vector<32x16xf32>
    %33 = vector.extract_strided_slice %31 {offsets = [0, 32], sizes = [32, 16], strides = [1, 1]} : vector<32x96xf32> to vector<32x16xf32>
    %34 = vector.extract_strided_slice %31 {offsets = [0, 64], sizes = [32, 16], strides = [1, 1]} : vector<32x96xf32> to vector<32x16xf32>
    %cst_34 = arith.constant dense<0.000000e+00> : vector<32x32xf32>
    %35 = tpu.matmul %32, %33, %cst_34 {dimension_numbers = #tpu.dot_dimension_numbers<[1], [1], [0], [0], [0, 0, 1, 0], [], []>} : vector<32x16xf32>, vector<32x16xf32>, vector<32x32xf32> -> vector<32x32xf32>
    %cst_35 = arith.constant 2.500000e-01 : f32
    %36 = vector.broadcast %cst_35 : f32 to vector<32x32xf32>
    %37 = arith.mulf %35, %36 : vector<32x32xf32>
    %38 = arith.addf %37, %1 : vector<32x32xf32>
    %cst_36 = arith.constant dense<0xFF800000> : vector<32xf32>
    %39 = vector.multi_reduction <maximumf>, %38, %cst_36 [1] : vector<32x32xf32> to vector<32xf32>
    %40 = vector.shape_cast %39 : vector<32xf32> to vector<32x1xf32>
    %41 = vector.broadcast %40 : vector<32x1xf32> to vector<32x32xf32>
    %42 = arith.subf %38, %41 : vector<32x32xf32>
    %43 = math.exp %42 : vector<32x32xf32>
    %cst_37 = arith.constant dense<0.000000e+00> : vector<32xf32>
    %44 = vector.multi_reduction <add>, %43, %cst_37 [1] : vector<32x32xf32> to vector<32xf32>
    %45 = vector.shape_cast %44 : vector<32xf32> to vector<32x1xf32>
    %46 = vector.broadcast %45 : vector<32x1xf32> to vector<32x32xf32>
    %47 = arith.divf %43, %46 : vector<32x32xf32>
    %cst_38 = arith.constant dense<0.000000e+00> : vector<32x16xf32>
    %48 = tpu.matmul %47, %34, %cst_38 {dimension_numbers = #tpu.dot_dimension_numbers<[1], [0], [0], [1], [0, 0, 1, 1], [], []>} : vector<32x32xf32>, vector<32x16xf32>, vector<32x16xf32> -> vector<32x16xf32>
    %49 = vector.extract_strided_slice %31 {offsets = [0, 16], sizes = [32, 16], strides = [1, 1]} : vector<32x96xf32> to vector<32x16xf32>
    %50 = vector.extract_strided_slice %31 {offsets = [0, 48], sizes = [32, 16], strides = [1, 1]} : vector<32x96xf32> to vector<32x16xf32>
    %51 = vector.extract_strided_slice %31 {offsets = [0, 80], sizes = [32, 16], strides = [1, 1]} : vector<32x96xf32> to vector<32x16xf32>
    %cst_39 = arith.constant dense<0.000000e+00> : vector<32x32xf32>
    %52 = tpu.matmul %49, %50, %cst_39 {dimension_numbers = #tpu.dot_dimension_numbers<[1], [1], [0], [0], [0, 0, 1, 0], [], []>} : vector<32x16xf32>, vector<32x16xf32>, vector<32x32xf32> -> vector<32x32xf32>
    %cst_40 = arith.constant 2.500000e-01 : f32
    %53 = vector.broadcast %cst_40 : f32 to vector<32x32xf32>
    %54 = arith.mulf %52, %53 : vector<32x32xf32>
    %55 = arith.addf %54, %1 : vector<32x32xf32>
    %cst_41 = arith.constant dense<0xFF800000> : vector<32xf32>
    %56 = vector.multi_reduction <maximumf>, %55, %cst_41 [1] : vector<32x32xf32> to vector<32xf32>
    %57 = vector.shape_cast %56 : vector<32xf32> to vector<32x1xf32>
    %58 = vector.broadcast %57 : vector<32x1xf32> to vector<32x32xf32>
    %59 = arith.subf %55, %58 : vector<32x32xf32>
    %60 = math.exp %59 : vector<32x32xf32>
    %cst_42 = arith.constant dense<0.000000e+00> : vector<32xf32>
    %61 = vector.multi_reduction <add>, %60, %cst_42 [1] : vector<32x32xf32> to vector<32xf32>
    %62 = vector.shape_cast %61 : vector<32xf32> to vector<32x1xf32>
    %63 = vector.broadcast %62 : vector<32x1xf32> to vector<32x32xf32>
    %64 = arith.divf %60, %63 : vector<32x32xf32>
    %cst_43 = arith.constant dense<0.000000e+00> : vector<32x16xf32>
    %65 = tpu.matmul %64, %51, %cst_43 {dimension_numbers = #tpu.dot_dimension_numbers<[1], [0], [0], [1], [0, 0, 1, 1], [], []>} : vector<32x32xf32>, vector<32x16xf32>, vector<32x16xf32> -> vector<32x16xf32>
    %66 = tpu.concatenate %48, %65 in 1 : vector<32x16xf32>, vector<32x16xf32> -> vector<32x32xf32>
    %cst_44 = arith.constant dense<0.000000e+00> : vector<32x32xf32>
    %67 = tpu.matmul %66, %8, %cst_44 {dimension_numbers = #tpu.dot_dimension_numbers<[1], [0], [0], [1], [0, 0, 1, 1], [], []>} : vector<32x32xf32>, vector<32x32xf32>, vector<32x32xf32> -> vector<32x32xf32>
    %68 = vector.broadcast %12 : vector<1x32xf32> to vector<32x32xf32>
    %69 = arith.addf %67, %68 : vector<32x32xf32>
    %70 = arith.addf %69, %0 : vector<32x32xf32>
    %cst_45 = arith.constant dense<0.000000e+00> : vector<32xf32>
    %71 = vector.multi_reduction <add>, %70, %cst_45 [1] : vector<32x32xf32> to vector<32xf32>
    %72 = vector.shape_cast %71 : vector<32xf32> to vector<32x1xf32>
    %cst_46 = arith.constant 3.200000e+01 : f32
    %73 = vector.broadcast %cst_46 : f32 to vector<32x1xf32>
    %74 = arith.divf %72, %73 : vector<32x1xf32>
    %75 = vector.broadcast %74 : vector<32x1xf32> to vector<32x32xf32>
    %76 = arith.subf %70, %75 : vector<32x32xf32>
    %77 = arith.mulf %76, %76 : vector<32x32xf32>
    %cst_47 = arith.constant dense<0.000000e+00> : vector<32xf32>
    %78 = vector.multi_reduction <add>, %77, %cst_47 [1] : vector<32x32xf32> to vector<32xf32>
    %79 = vector.shape_cast %78 : vector<32xf32> to vector<32x1xf32>
    %cst_48 = arith.constant 3.200000e+01 : f32
    %80 = vector.broadcast %cst_48 : f32 to vector<32x1xf32>
    %81 = arith.divf %79, %80 : vector<32x1xf32>
    %82 = vector.broadcast %74 : vector<32x1xf32> to vector<32x32xf32>
    %83 = arith.subf %70, %82 : vector<32x32xf32>
    %cst_49 = arith.constant 9.99999997E-7 : f32
    %84 = vector.broadcast %cst_49 : f32 to vector<32x1xf32>
    %85 = arith.addf %81, %84 : vector<32x1xf32>
    %86 = math.rsqrt %85 : vector<32x1xf32>
    %87 = vector.broadcast %86 : vector<32x1xf32> to vector<32x32xf32>
    %88 = arith.mulf %83, %87 : vector<32x32xf32>
    %89 = vector.broadcast %14 : vector<1x32xf32> to vector<32x32xf32>
    %90 = arith.mulf %88, %89 : vector<32x32xf32>
    %91 = vector.broadcast %16 : vector<1x32xf32> to vector<32x32xf32>
    %92 = arith.addf %90, %91 : vector<32x32xf32>
    %cst_50 = arith.constant dense<0.000000e+00> : vector<32x64xf32>
    %93 = tpu.matmul %92, %26, %cst_50 {dimension_numbers = #tpu.dot_dimension_numbers<[1], [0], [0], [1], [0, 0, 1, 1], [], []>} : vector<32x32xf32>, vector<32x64xf32>, vector<32x64xf32> -> vector<32x64xf32>
    %94 = vector.broadcast %18 : vector<1x64xf32> to vector<32x64xf32>
    %95 = arith.addf %93, %94 : vector<32x64xf32>
    %cst_51 = arith.constant 5.000000e-01 : f32
    %96 = vector.broadcast %cst_51 : f32 to vector<32x64xf32>
    %97 = arith.mulf %96, %95 : vector<32x64xf32>
    %cst_52 = arith.constant 4.471500e-02 : f32
    %98 = vector.broadcast %cst_52 : f32 to vector<32x64xf32>
    %99 = arith.mulf %98, %95 : vector<32x64xf32>
    %100 = arith.mulf %99, %95 : vector<32x64xf32>
    %101 = arith.mulf %100, %95 : vector<32x64xf32>
    %102 = arith.addf %95, %101 : vector<32x64xf32>
    %cst_53 = arith.constant 0.797884583 : f32
    %103 = vector.broadcast %cst_53 : f32 to vector<32x64xf32>
    %104 = arith.mulf %103, %102 : vector<32x64xf32>
    %105 = math.tanh %104 : vector<32x64xf32>
    %cst_54 = arith.constant 1.000000e+00 : f32
    %106 = vector.broadcast %cst_54 : f32 to vector<32x64xf32>
    %107 = arith.addf %106, %105 : vector<32x64xf32>
    %108 = arith.mulf %97, %107 : vector<32x64xf32>
    %cst_55 = arith.constant dense<0.000000e+00> : vector<32x32xf32>
    %109 = tpu.matmul %108, %28, %cst_55 {dimension_numbers = #tpu.dot_dimension_numbers<[1], [0], [0], [1], [0, 0, 1, 1], [], []>} : vector<32x64xf32>, vector<64x32xf32>, vector<32x32xf32> -> vector<32x32xf32>
    %110 = vector.broadcast %20 : vector<1x32xf32> to vector<32x32xf32>
    %111 = arith.addf %109, %110 : vector<32x32xf32>
    %112 = arith.addf %111, %92 : vector<32x32xf32>
    %cst_56 = arith.constant dense<0.000000e+00> : vector<32xf32>
    %113 = vector.multi_reduction <add>, %112, %cst_56 [1] : vector<32x32xf32> to vector<32xf32>
    %114 = vector.shape_cast %113 : vector<32xf32> to vector<32x1xf32>
    %cst_57 = arith.constant 3.200000e+01 : f32
    %115 = vector.broadcast %cst_57 : f32 to vector<32x1xf32>
    %116 = arith.divf %114, %115 : vector<32x1xf32>
    %117 = vector.broadcast %116 : vector<32x1xf32> to vector<32x32xf32>
    %118 = arith.subf %112, %117 : vector<32x32xf32>
    %119 = arith.mulf %118, %118 : vector<32x32xf32>
    %cst_58 = arith.constant dense<0.000000e+00> : vector<32xf32>
    %120 = vector.multi_reduction <add>, %119, %cst_58 [1] : vector<32x32xf32> to vector<32xf32>
    %121 = vector.shape_cast %120 : vector<32xf32> to vector<32x1xf32>
    %cst_59 = arith.constant 3.200000e+01 : f32
    %122 = vector.broadcast %cst_59 : f32 to vector<32x1xf32>
    %123 = arith.divf %121, %122 : vector<32x1xf32>
    %124 = vector.broadcast %116 : vector<32x1xf32> to vector<32x32xf32>
    %125 = arith.subf %112, %124 : vector<32x32xf32>
    %cst_60 = arith.constant 9.99999997E-7 : f32
    %126 = vector.broadcast %cst_60 : f32 to vector<32x1xf32>
    %127 = arith.addf %123, %126 : vector<32x1xf32>
    %128 = math.rsqrt %127 : vector<32x1xf32>
    %129 = vector.broadcast %128 : vector<32x1xf32> to vector<32x32xf32>
    %130 = arith.mulf %125, %129 : vector<32x32xf32>
    %131 = vector.broadcast %22 : vector<1x32xf32> to vector<32x32xf32>
    %132 = arith.mulf %130, %131 : vector<32x32xf32>
    %133 = vector.broadcast %24 : vector<1x32xf32> to vector<32x32xf32>
    %134 = arith.addf %132, %133 : vector<32x32xf32>
    %c1_61 = arith.constant 1 : index
    %c0_62 = arith.constant 0 : index
    %c0_63 = arith.constant 0 : index
    %135 = vector.load %arg4[%c1_61, %c0_62, %c0_63] : memref<2x32x128xf32, #tpu.memory_space<vmem>>, vector<1x32x96xf32>
    %136 = vector.shape_cast %135 : vector<1x32x96xf32> to vector<32x96xf32>
    %c1_64 = arith.constant 1 : index
    %c0_65 = arith.constant 0 : index
    %c96_66 = arith.constant 96 : index
    %137 = vector.load %arg4[%c1_64, %c0_65, %c96_66] : memref<2x32x128xf32, #tpu.memory_space<vmem>>, vector<1x32x32xf32>
    %138 = vector.shape_cast %137 : vector<1x32x32xf32> to vector<32x32xf32>
    %c1_67 = arith.constant 1 : index
    %c0_68 = arith.constant 0 : index
    %c0_69 = arith.constant 0 : index
    %139 = vector.load %arg5[%c1_67, %c0_68, %c0_69] : memref<2x8x128xf32, #tpu.memory_space<vmem>>, vector<1x1x96xf32>
    %140 = vector.shape_cast %139 : vector<1x1x96xf32> to vector<1x96xf32>
    %c1_70 = arith.constant 1 : index
    %c1_71 = arith.constant 1 : index
    %c0_72 = arith.constant 0 : index
    %141 = vector.load %arg5[%c1_70, %c1_71, %c0_72] : memref<2x8x128xf32, #tpu.memory_space<vmem>>, vector<1x1x32xf32>
    %142 = vector.shape_cast %141 : vector<1x1x32xf32> to vector<1x32xf32>
    %c1_73 = arith.constant 1 : index
    %c2_74 = arith.constant 2 : index
    %c0_75 = arith.constant 0 : index
    %143 = vector.load %arg5[%c1_73, %c2_74, %c0_75] : memref<2x8x128xf32, #tpu.memory_space<vmem>>, vector<1x1x32xf32>
    %144 = vector.shape_cast %143 : vector<1x1x32xf32> to vector<1x32xf32>
    %c1_76 = arith.constant 1 : index
    %c3_77 = arith.constant 3 : index
    %c0_78 = arith.constant 0 : index
    %145 = vector.load %arg5[%c1_76, %c3_77, %c0_78] : memref<2x8x128xf32, #tpu.memory_space<vmem>>, vector<1x1x32xf32>
    %146 = vector.shape_cast %145 : vector<1x1x32xf32> to vector<1x32xf32>
    %c1_79 = arith.constant 1 : index
    %c4_80 = arith.constant 4 : index
    %c0_81 = arith.constant 0 : index
    %147 = vector.load %arg5[%c1_79, %c4_80, %c0_81] : memref<2x8x128xf32, #tpu.memory_space<vmem>>, vector<1x1x64xf32>
    %148 = vector.shape_cast %147 : vector<1x1x64xf32> to vector<1x64xf32>
    %c1_82 = arith.constant 1 : index
    %c5_83 = arith.constant 5 : index
    %c0_84 = arith.constant 0 : index
    %149 = vector.load %arg5[%c1_82, %c5_83, %c0_84] : memref<2x8x128xf32, #tpu.memory_space<vmem>>, vector<1x1x32xf32>
    %150 = vector.shape_cast %149 : vector<1x1x32xf32> to vector<1x32xf32>
    %c1_85 = arith.constant 1 : index
    %c6_86 = arith.constant 6 : index
    %c0_87 = arith.constant 0 : index
    %151 = vector.load %arg5[%c1_85, %c6_86, %c0_87] : memref<2x8x128xf32, #tpu.memory_space<vmem>>, vector<1x1x32xf32>
    %152 = vector.shape_cast %151 : vector<1x1x32xf32> to vector<1x32xf32>
    %c1_88 = arith.constant 1 : index
    %c7_89 = arith.constant 7 : index
    %c0_90 = arith.constant 0 : index
    %153 = vector.load %arg5[%c1_88, %c7_89, %c0_90] : memref<2x8x128xf32, #tpu.memory_space<vmem>>, vector<1x1x32xf32>
    %154 = vector.shape_cast %153 : vector<1x1x32xf32> to vector<1x32xf32>
    %c1_91 = arith.constant 1 : index
    %c0_92 = arith.constant 0 : index
    %c0_93 = arith.constant 0 : index
    %155 = vector.load %arg6[%c1_91, %c0_92, %c0_93] : memref<2x96x64xf32, #tpu.memory_space<vmem>>, vector<1x32x64xf32>
    %156 = vector.shape_cast %155 : vector<1x32x64xf32> to vector<32x64xf32>
    %c1_94 = arith.constant 1 : index
    %c32_95 = arith.constant 32 : index
    %c0_96 = arith.constant 0 : index
    %157 = vector.load %arg6[%c1_94, %c32_95, %c0_96] : memref<2x96x64xf32, #tpu.memory_space<vmem>>, vector<1x64x32xf32>
    %158 = vector.shape_cast %157 : vector<1x64x32xf32> to vector<64x32xf32>
    %cst_97 = arith.constant dense<0.000000e+00> : vector<32x96xf32>
    %159 = tpu.matmul %134, %136, %cst_97 {dimension_numbers = #tpu.dot_dimension_numbers<[1], [0], [0], [1], [0, 0, 1, 1], [], []>} : vector<32x32xf32>, vector<32x96xf32>, vector<32x96xf32> -> vector<32x96xf32>
    %160 = vector.broadcast %140 : vector<1x96xf32> to vector<32x96xf32>
    %161 = arith.addf %159, %160 : vector<32x96xf32>
    %162 = vector.extract_strided_slice %161 {offsets = [0, 0], sizes = [32, 16], strides = [1, 1]} : vector<32x96xf32> to vector<32x16xf32>
    %163 = vector.extract_strided_slice %161 {offsets = [0, 32], sizes = [32, 16], strides = [1, 1]} : vector<32x96xf32> to vector<32x16xf32>
    %164 = vector.extract_strided_slice %161 {offsets = [0, 64], sizes = [32, 16], strides = [1, 1]} : vector<32x96xf32> to vector<32x16xf32>
    %cst_98 = arith.constant dense<0.000000e+00> : vector<32x32xf32>
    %165 = tpu.matmul %162, %163, %cst_98 {dimension_numbers = #tpu.dot_dimension_numbers<[1], [1], [0], [0], [0, 0, 1, 0], [], []>} : vector<32x16xf32>, vector<32x16xf32>, vector<32x32xf32> -> vector<32x32xf32>
    %cst_99 = arith.constant 2.500000e-01 : f32
    %166 = vector.broadcast %cst_99 : f32 to vector<32x32xf32>
    %167 = arith.mulf %165, %166 : vector<32x32xf32>
    %168 = arith.addf %167, %1 : vector<32x32xf32>
    %cst_100 = arith.constant dense<0xFF800000> : vector<32xf32>
    %169 = vector.multi_reduction <maximumf>, %168, %cst_100 [1] : vector<32x32xf32> to vector<32xf32>
    %170 = vector.shape_cast %169 : vector<32xf32> to vector<32x1xf32>
    %171 = vector.broadcast %170 : vector<32x1xf32> to vector<32x32xf32>
    %172 = arith.subf %168, %171 : vector<32x32xf32>
    %173 = math.exp %172 : vector<32x32xf32>
    %cst_101 = arith.constant dense<0.000000e+00> : vector<32xf32>
    %174 = vector.multi_reduction <add>, %173, %cst_101 [1] : vector<32x32xf32> to vector<32xf32>
    %175 = vector.shape_cast %174 : vector<32xf32> to vector<32x1xf32>
    %176 = vector.broadcast %175 : vector<32x1xf32> to vector<32x32xf32>
    %177 = arith.divf %173, %176 : vector<32x32xf32>
    %cst_102 = arith.constant dense<0.000000e+00> : vector<32x16xf32>
    %178 = tpu.matmul %177, %164, %cst_102 {dimension_numbers = #tpu.dot_dimension_numbers<[1], [0], [0], [1], [0, 0, 1, 1], [], []>} : vector<32x32xf32>, vector<32x16xf32>, vector<32x16xf32> -> vector<32x16xf32>
    %179 = vector.extract_strided_slice %161 {offsets = [0, 16], sizes = [32, 16], strides = [1, 1]} : vector<32x96xf32> to vector<32x16xf32>
    %180 = vector.extract_strided_slice %161 {offsets = [0, 48], sizes = [32, 16], strides = [1, 1]} : vector<32x96xf32> to vector<32x16xf32>
    %181 = vector.extract_strided_slice %161 {offsets = [0, 80], sizes = [32, 16], strides = [1, 1]} : vector<32x96xf32> to vector<32x16xf32>
    %cst_103 = arith.constant dense<0.000000e+00> : vector<32x32xf32>
    %182 = tpu.matmul %179, %180, %cst_103 {dimension_numbers = #tpu.dot_dimension_numbers<[1], [1], [0], [0], [0, 0, 1, 0], [], []>} : vector<32x16xf32>, vector<32x16xf32>, vector<32x32xf32> -> vector<32x32xf32>
    %cst_104 = arith.constant 2.500000e-01 : f32
    %183 = vector.broadcast %cst_104 : f32 to vector<32x32xf32>
    %184 = arith.mulf %182, %183 : vector<32x32xf32>
    %185 = arith.addf %184, %1 : vector<32x32xf32>
    %cst_105 = arith.constant dense<0xFF800000> : vector<32xf32>
    %186 = vector.multi_reduction <maximumf>, %185, %cst_105 [1] : vector<32x32xf32> to vector<32xf32>
    %187 = vector.shape_cast %186 : vector<32xf32> to vector<32x1xf32>
    %188 = vector.broadcast %187 : vector<32x1xf32> to vector<32x32xf32>
    %189 = arith.subf %185, %188 : vector<32x32xf32>
    %190 = math.exp %189 : vector<32x32xf32>
    %cst_106 = arith.constant dense<0.000000e+00> : vector<32xf32>
    %191 = vector.multi_reduction <add>, %190, %cst_106 [1] : vector<32x32xf32> to vector<32xf32>
    %192 = vector.shape_cast %191 : vector<32xf32> to vector<32x1xf32>
    %193 = vector.broadcast %192 : vector<32x1xf32> to vector<32x32xf32>
    %194 = arith.divf %190, %193 : vector<32x32xf32>
    %cst_107 = arith.constant dense<0.000000e+00> : vector<32x16xf32>
    %195 = tpu.matmul %194, %181, %cst_107 {dimension_numbers = #tpu.dot_dimension_numbers<[1], [0], [0], [1], [0, 0, 1, 1], [], []>} : vector<32x32xf32>, vector<32x16xf32>, vector<32x16xf32> -> vector<32x16xf32>
    %196 = tpu.concatenate %178, %195 in 1 : vector<32x16xf32>, vector<32x16xf32> -> vector<32x32xf32>
    %cst_108 = arith.constant dense<0.000000e+00> : vector<32x32xf32>
    %197 = tpu.matmul %196, %138, %cst_108 {dimension_numbers = #tpu.dot_dimension_numbers<[1], [0], [0], [1], [0, 0, 1, 1], [], []>} : vector<32x32xf32>, vector<32x32xf32>, vector<32x32xf32> -> vector<32x32xf32>
    %198 = vector.broadcast %142 : vector<1x32xf32> to vector<32x32xf32>
    %199 = arith.addf %197, %198 : vector<32x32xf32>
    %200 = arith.addf %199, %134 : vector<32x32xf32>
    %cst_109 = arith.constant dense<0.000000e+00> : vector<32xf32>
    %201 = vector.multi_reduction <add>, %200, %cst_109 [1] : vector<32x32xf32> to vector<32xf32>
    %202 = vector.shape_cast %201 : vector<32xf32> to vector<32x1xf32>
    %cst_110 = arith.constant 3.200000e+01 : f32
    %203 = vector.broadcast %cst_110 : f32 to vector<32x1xf32>
    %204 = arith.divf %202, %203 : vector<32x1xf32>
    %205 = vector.broadcast %204 : vector<32x1xf32> to vector<32x32xf32>
    %206 = arith.subf %200, %205 : vector<32x32xf32>
    %207 = arith.mulf %206, %206 : vector<32x32xf32>
    %cst_111 = arith.constant dense<0.000000e+00> : vector<32xf32>
    %208 = vector.multi_reduction <add>, %207, %cst_111 [1] : vector<32x32xf32> to vector<32xf32>
    %209 = vector.shape_cast %208 : vector<32xf32> to vector<32x1xf32>
    %cst_112 = arith.constant 3.200000e+01 : f32
    %210 = vector.broadcast %cst_112 : f32 to vector<32x1xf32>
    %211 = arith.divf %209, %210 : vector<32x1xf32>
    %212 = vector.broadcast %204 : vector<32x1xf32> to vector<32x32xf32>
    %213 = arith.subf %200, %212 : vector<32x32xf32>
    %cst_113 = arith.constant 9.99999997E-7 : f32
    %214 = vector.broadcast %cst_113 : f32 to vector<32x1xf32>
    %215 = arith.addf %211, %214 : vector<32x1xf32>
    %216 = math.rsqrt %215 : vector<32x1xf32>
    %217 = vector.broadcast %216 : vector<32x1xf32> to vector<32x32xf32>
    %218 = arith.mulf %213, %217 : vector<32x32xf32>
    %219 = vector.broadcast %144 : vector<1x32xf32> to vector<32x32xf32>
    %220 = arith.mulf %218, %219 : vector<32x32xf32>
    %221 = vector.broadcast %146 : vector<1x32xf32> to vector<32x32xf32>
    %222 = arith.addf %220, %221 : vector<32x32xf32>
    %cst_114 = arith.constant dense<0.000000e+00> : vector<32x64xf32>
    %223 = tpu.matmul %222, %156, %cst_114 {dimension_numbers = #tpu.dot_dimension_numbers<[1], [0], [0], [1], [0, 0, 1, 1], [], []>} : vector<32x32xf32>, vector<32x64xf32>, vector<32x64xf32> -> vector<32x64xf32>
    %224 = vector.broadcast %148 : vector<1x64xf32> to vector<32x64xf32>
    %225 = arith.addf %223, %224 : vector<32x64xf32>
    %cst_115 = arith.constant 5.000000e-01 : f32
    %226 = vector.broadcast %cst_115 : f32 to vector<32x64xf32>
    %227 = arith.mulf %226, %225 : vector<32x64xf32>
    %cst_116 = arith.constant 4.471500e-02 : f32
    %228 = vector.broadcast %cst_116 : f32 to vector<32x64xf32>
    %229 = arith.mulf %228, %225 : vector<32x64xf32>
    %230 = arith.mulf %229, %225 : vector<32x64xf32>
    %231 = arith.mulf %230, %225 : vector<32x64xf32>
    %232 = arith.addf %225, %231 : vector<32x64xf32>
    %cst_117 = arith.constant 0.797884583 : f32
    %233 = vector.broadcast %cst_117 : f32 to vector<32x64xf32>
    %234 = arith.mulf %233, %232 : vector<32x64xf32>
    %235 = math.tanh %234 : vector<32x64xf32>
    %cst_118 = arith.constant 1.000000e+00 : f32
    %236 = vector.broadcast %cst_118 : f32 to vector<32x64xf32>
    %237 = arith.addf %236, %235 : vector<32x64xf32>
    %238 = arith.mulf %227, %237 : vector<32x64xf32>
    %cst_119 = arith.constant dense<0.000000e+00> : vector<32x32xf32>
    %239 = tpu.matmul %238, %158, %cst_119 {dimension_numbers = #tpu.dot_dimension_numbers<[1], [0], [0], [1], [0, 0, 1, 1], [], []>} : vector<32x64xf32>, vector<64x32xf32>, vector<32x32xf32> -> vector<32x32xf32>
    %240 = vector.broadcast %150 : vector<1x32xf32> to vector<32x32xf32>
    %241 = arith.addf %239, %240 : vector<32x32xf32>
    %242 = arith.addf %241, %222 : vector<32x32xf32>
    %cst_120 = arith.constant dense<0.000000e+00> : vector<32xf32>
    %243 = vector.multi_reduction <add>, %242, %cst_120 [1] : vector<32x32xf32> to vector<32xf32>
    %244 = vector.shape_cast %243 : vector<32xf32> to vector<32x1xf32>
    %cst_121 = arith.constant 3.200000e+01 : f32
    %245 = vector.broadcast %cst_121 : f32 to vector<32x1xf32>
    %246 = arith.divf %244, %245 : vector<32x1xf32>
    %247 = vector.broadcast %246 : vector<32x1xf32> to vector<32x32xf32>
    %248 = arith.subf %242, %247 : vector<32x32xf32>
    %249 = arith.mulf %248, %248 : vector<32x32xf32>
    %cst_122 = arith.constant dense<0.000000e+00> : vector<32xf32>
    %250 = vector.multi_reduction <add>, %249, %cst_122 [1] : vector<32x32xf32> to vector<32xf32>
    %251 = vector.shape_cast %250 : vector<32xf32> to vector<32x1xf32>
    %cst_123 = arith.constant 3.200000e+01 : f32
    %252 = vector.broadcast %cst_123 : f32 to vector<32x1xf32>
    %253 = arith.divf %251, %252 : vector<32x1xf32>
    %254 = vector.broadcast %246 : vector<32x1xf32> to vector<32x32xf32>
    %255 = arith.subf %242, %254 : vector<32x32xf32>
    %cst_124 = arith.constant 9.99999997E-7 : f32
    %256 = vector.broadcast %cst_124 : f32 to vector<32x1xf32>
    %257 = arith.addf %253, %256 : vector<32x1xf32>
    %258 = math.rsqrt %257 : vector<32x1xf32>
    %259 = vector.broadcast %258 : vector<32x1xf32> to vector<32x32xf32>
    %260 = arith.mulf %255, %259 : vector<32x32xf32>
    %261 = vector.broadcast %152 : vector<1x32xf32> to vector<32x32xf32>
    %262 = arith.mulf %260, %261 : vector<32x32xf32>
    %263 = vector.broadcast %154 : vector<1x32xf32> to vector<32x32xf32>
    %264 = arith.addf %262, %263 : vector<32x32xf32>
    %c0_125 = arith.constant 0 : index
    %c0_126 = arith.constant 0 : index
    %265 = vector.load %arg3[%c0_125, %c0_126] : memref<40x32xf32, #tpu.memory_space<vmem>>, vector<16x32xf32>
    %c16 = arith.constant 16 : index
    %c0_127 = arith.constant 0 : index
    %266 = vector.load %arg3[%c16, %c0_127] : memref<40x32xf32, #tpu.memory_space<vmem>>, vector<2x32xf32>
    %c18 = arith.constant 18 : index
    %c0_128 = arith.constant 0 : index
    %267 = vector.load %arg3[%c18, %c0_128] : memref<40x32xf32, #tpu.memory_space<vmem>>, vector<16x32xf32>
    %c0_129 = arith.constant 0 : index
    %c0_130 = arith.constant 0 : index
    %268 = vector.load %arg7[%c0_129, %c0_130] : memref<32x256xf32, #tpu.memory_space<vmem>>, vector<32x32xf32>
    %c0_131 = arith.constant 0 : index
    %c32_132 = arith.constant 32 : index
    %269 = vector.load %arg7[%c0_131, %c32_132] : memref<32x256xf32, #tpu.memory_space<vmem>>, vector<32x32xf32>
    %c0_133 = arith.constant 0 : index
    %c64 = arith.constant 64 : index
    %270 = vector.load %arg7[%c0_133, %c64] : memref<32x256xf32, #tpu.memory_space<vmem>>, vector<32x32xf32>
    %c0_134 = arith.constant 0 : index
    %c96_135 = arith.constant 96 : index
    %271 = vector.load %arg7[%c0_134, %c96_135] : memref<32x256xf32, #tpu.memory_space<vmem>>, vector<32x32xf32>
    %c0_136 = arith.constant 0 : index
    %c128 = arith.constant 128 : index
    %272 = vector.load %arg7[%c0_136, %c128] : memref<32x256xf32, #tpu.memory_space<vmem>>, vector<32x128xf32>
    %cst_137 = arith.constant dense<0.000000e+00> : vector<2x32xf32>
    %273 = tpu.matmul %266, %264, %cst_137 {dimension_numbers = #tpu.dot_dimension_numbers<[1], [0], [0], [1], [0, 0, 1, 1], [], []>} : vector<2x32xf32>, vector<32x32xf32>, vector<2x32xf32> -> vector<2x32xf32>
    %cst_138 = arith.constant dense<0.000000e+00> : vector<16x32xf32>
    %274 = tpu.matmul %265, %264, %cst_138 {dimension_numbers = #tpu.dot_dimension_numbers<[1], [0], [0], [1], [0, 0, 1, 1], [], []>} : vector<16x32xf32>, vector<32x32xf32>, vector<16x32xf32> -> vector<16x32xf32>
    %275 = arith.addf %267, %274 : vector<16x32xf32>
    %cst_139 = arith.constant dense<0.000000e+00> : vector<16x32xf32>
    %276 = tpu.matmul %275, %268, %cst_139 {dimension_numbers = #tpu.dot_dimension_numbers<[1], [0], [0], [1], [0, 0, 1, 1], [], []>} : vector<16x32xf32>, vector<32x32xf32>, vector<16x32xf32> -> vector<16x32xf32>
    %cst_140 = arith.constant dense<0.000000e+00> : vector<32x32xf32>
    %277 = tpu.matmul %264, %269, %cst_140 {dimension_numbers = #tpu.dot_dimension_numbers<[1], [0], [0], [1], [0, 0, 1, 1], [], []>} : vector<32x32xf32>, vector<32x32xf32>, vector<32x32xf32> -> vector<32x32xf32>
    %cst_141 = arith.constant dense<0.000000e+00> : vector<32x32xf32>
    %278 = tpu.matmul %264, %270, %cst_141 {dimension_numbers = #tpu.dot_dimension_numbers<[1], [0], [0], [1], [0, 0, 1, 1], [], []>} : vector<32x32xf32>, vector<32x32xf32>, vector<32x32xf32> -> vector<32x32xf32>
    %cst_142 = arith.constant dense<0.000000e+00> : vector<16x32xf32>
    %279 = tpu.matmul %276, %277, %cst_142 {dimension_numbers = #tpu.dot_dimension_numbers<[1], [1], [0], [0], [0, 0, 1, 0], [], []>} : vector<16x32xf32>, vector<32x32xf32>, vector<16x32xf32> -> vector<16x32xf32>
    %cst_143 = arith.constant 0.176776692 : f32
    %280 = vector.broadcast %cst_143 : f32 to vector<16x32xf32>
    %281 = arith.mulf %279, %280 : vector<16x32xf32>
    %282 = arith.addf %281, %2 : vector<16x32xf32>
    %cst_144 = arith.constant dense<0xFF800000> : vector<16xf32>
    %283 = vector.multi_reduction <maximumf>, %282, %cst_144 [1] : vector<16x32xf32> to vector<16xf32>
    %284 = vector.shape_cast %283 : vector<16xf32> to vector<16x1xf32>
    %285 = vector.broadcast %284 : vector<16x1xf32> to vector<16x32xf32>
    %286 = arith.subf %282, %285 : vector<16x32xf32>
    %287 = math.exp %286 : vector<16x32xf32>
    %cst_145 = arith.constant dense<0.000000e+00> : vector<16xf32>
    %288 = vector.multi_reduction <add>, %287, %cst_145 [1] : vector<16x32xf32> to vector<16xf32>
    %289 = vector.shape_cast %288 : vector<16xf32> to vector<16x1xf32>
    %290 = vector.broadcast %289 : vector<16x1xf32> to vector<16x32xf32>
    %291 = arith.divf %287, %290 : vector<16x32xf32>
    %cst_146 = arith.constant dense<0.000000e+00> : vector<16x32xf32>
    %292 = tpu.matmul %291, %278, %cst_146 {dimension_numbers = #tpu.dot_dimension_numbers<[1], [0], [0], [1], [0, 0, 1, 1], [], []>} : vector<16x32xf32>, vector<32x32xf32>, vector<16x32xf32> -> vector<16x32xf32>
    %293 = arith.addf %292, %275 : vector<16x32xf32>
    %cst_147 = arith.constant dense<0.000000e+00> : vector<16x128xf32>
    %294 = tpu.matmul %293, %272, %cst_147 {dimension_numbers = #tpu.dot_dimension_numbers<[1], [0], [0], [1], [0, 0, 1, 1], [], []>} : vector<16x32xf32>, vector<32x128xf32>, vector<16x128xf32> -> vector<16x128xf32>
    %295 = vector.broadcast %4 : vector<1x128xf32> to vector<16x128xf32>
    %296 = arith.addf %294, %295 : vector<16x128xf32>
    %cst_148 = arith.constant dense<0.000000e+00> : vector<2x32xf32>
    %297 = tpu.matmul %273, %271, %cst_148 {dimension_numbers = #tpu.dot_dimension_numbers<[1], [0], [0], [1], [0, 0, 1, 1], [], []>} : vector<2x32xf32>, vector<32x32xf32>, vector<2x32xf32> -> vector<2x32xf32>
    %cst_149 = arith.constant dense<0.000000e+00> : vector<2x32xf32>
    %298 = tpu.matmul %297, %264, %cst_149 {dimension_numbers = #tpu.dot_dimension_numbers<[1], [1], [0], [0], [0, 0, 1, 0], [], []>} : vector<2x32xf32>, vector<32x32xf32>, vector<2x32xf32> -> vector<2x32xf32>
    %299 = arith.addf %298, %3 : vector<2x32xf32>
    %cst_150 = arith.constant 0.000000e+00 : f32
    %300 = vector.broadcast %cst_150 : f32 to vector<2x96xf32>
    %301 = tpu.concatenate %299, %300 in 1 : vector<2x32xf32>, vector<2x96xf32> -> vector<2x128xf32>
    %cst_151 = arith.constant 0.000000e+00 : f32
    %302 = vector.broadcast %cst_151 : f32 to vector<6x128xf32>
    %303 = tpu.concatenate %296, %301, %302 in 0 : vector<16x128xf32>, vector<2x128xf32>, vector<6x128xf32> -> vector<24x128xf32>
    %c0_152 = arith.constant 0 : index
    %c0_153 = arith.constant 0 : index
    %304 = vector.load %arg8[%c0_152, %c0_153] : memref<24x128xf32, #tpu.memory_space<vmem>>, vector<24x128xf32>
    tpu.vector_store %arg8[%c0_152, %c0_153], %303 {strides = array<i32>} : memref<24x128xf32, #tpu.memory_space<vmem>>, vector<24x128xf32>,
    return
  }
  func.func @transform_0(%arg0: i32) -> (i32, i32) {
    %c0_i32 = arith.constant 0 : i32
    %c0_i32_0 = arith.constant 0 : i32
    %c0_i32_1 = arith.constant 0 : i32
    return %c0_i32, %c0_i32_0 : i32, i32
  }
  func.func @transform_1(%arg0: i32) -> (i32, i32) {
    %c0_i32 = arith.constant 0 : i32
    %c0_i32_0 = arith.constant 0 : i32
    %c0_i32_1 = arith.constant 0 : i32
    return %c0_i32, %c0_i32_0 : i32, i32
  }
  func.func @transform_2(%arg0: i32) -> (i32, i32) {
    %c0_i32 = arith.constant 0 : i32
    %c0_i32_0 = arith.constant 0 : i32
    %c0_i32_1 = arith.constant 0 : i32
    return %c0_i32, %c0_i32_0 : i32, i32
  }
  func.func @transform_3(%arg0: i32) -> (i32, i32, i32) {
    %c0_i32 = arith.constant 0 : i32
    %c0_i32_0 = arith.constant 0 : i32
    %c0_i32_1 = arith.constant 0 : i32
    %c0_i32_2 = arith.constant 0 : i32
    return %c0_i32, %c0_i32_0, %c0_i32_1 : i32, i32, i32
  }
  func.func @transform_4(%arg0: i32) -> (i32, i32, i32) {
    %c0_i32 = arith.constant 0 : i32
    %c0_i32_0 = arith.constant 0 : i32
    %c0_i32_1 = arith.constant 0 : i32
    %c0_i32_2 = arith.constant 0 : i32
    return %c0_i32, %c0_i32_0, %c0_i32_1 : i32, i32, i32
  }
  func.func @transform_5(%arg0: i32) -> (i32, i32, i32) {
    %c0_i32 = arith.constant 0 : i32
    %c0_i32_0 = arith.constant 0 : i32
    %c0_i32_1 = arith.constant 0 : i32
    %c0_i32_2 = arith.constant 0 : i32
    return %c0_i32, %c0_i32_0, %c0_i32_1 : i32, i32, i32
  }
  func.func @transform_6(%arg0: i32) -> (i32, i32) {
    %c0_i32 = arith.constant 0 : i32
    %c0_i32_0 = arith.constant 0 : i32
    %c0_i32_1 = arith.constant 0 : i32
    return %c0_i32, %c0_i32_0 : i32, i32
  }
  func.func @transform_7(%arg0: i32) -> (i32, i32) {
    %c0_i32 = arith.constant 0 : i32
    %c0_i32_0 = arith.constant 0 : i32
    %c0_i32_1 = arith.constant 0 : i32
    return %c0_i32, %c0_i32_0 : i32, i32
  }
}

</mosaic_0001>

<bundles_post_ra>
// kernel: fptuta_forward.1
= control target key start
LH: loop header
LB: loop body
LE: loop exit
PB: predicated region body
PF: predicated region fallthrough
CT: control target
= control target key end

     0   :  { %vm66_vm0 = vcmask 261120   ;;  %vm176_vm1 = vcmask 130048   ;;  %s4186_s19 = smov 96   ;;  %s4188_s28 = smov 80   ;;  %vm1068_vm2 = vcmask 523264   ;;  %vm4194_vm3 = vmmov 0   ;;  %s5062_s3 = inlined_call_operand.vmem [shape: f32[2,32,128], index: 3, kind: input, shape index: {}]   ;;  %s5063_s0 = inlined_call_operand.vmem [shape: f32[32,32], index: 0, kind: input, shape index: {}]   ;;  %s5064_s4 = inlined_call_operand.vmem [shape: f32[2,8,128], index: 4, kind: input, shape index: {}]   ;;  %s5065_s1 = inlined_call_operand.vmem [shape: f32[56,128], index: 1, kind: input, shape index: {}]   ;;  %s5066_s5 = inlined_call_operand.vmem [shape: f32[2,96,64], index: 5, kind: input, shape index: {}]   ;;  %s5067_s6 = inlined_call_operand.vmem [shape: f32[32,256], index: 6, kind: input, shape index: {}]   ;;  %s5068_s2 = inlined_call_operand.vmem [shape: f32[40,32], index: 2, kind: input, shape index: {}]   ;;  %s5069_s7 = inlined_call_operand.vmem [shape: f32[24,128], index: 7, kind: output, shape index: {}]  }
   0x1   :  { %v4238_v0 = vld [vmem:[%s5062_s3 + $0x18] sm:$0xff]  ;;  %v4243_v1 = vld [vmem:[%s5062_s3 + $0x10] sm:$0xff]  ;;  %v4249_v2 = vld [vmem:[%s5063_s0] sm:$0xff]  ;;  %s4189_s29 = smov 112   ;;  %s4190_s30 = smov 48   ;;  %vm3341_vm4 = vcmask 1041408  }
   0x2   :  { %3697 = vmatprep.subr.mxu1 %v4238_v0  ;;  %v4255_v3 = vld [vmem:[%s5062_s3 + $0x8] sm:$0xff]  ;;  %3705 = vmatprep.mubr.msk.f32.mxu1 %vm66_vm0, %v4249_v2  ;;  %v4264_v4 = vld [vmem:[%s5062_s3] sm:$0xff]  ;;  %v4277_v6 = vld [vmem:[%s5063_s0 + $0x10] sm:$0xff]  ;;  %s4191_s8 = smov 32   ;;  %s4192_s9 = smov 16  }
   0x3   :  { %3698 = vmatpush3.msra.mxu1 %v4238_v0  ;;  %v4271_v5 = vld [vmem:[%s5063_s0 + $0x8] sm:$0xff]  ;;  %v4287_v7 = vld [vmem:[%s5063_s0 + $0x18] sm:$0xff]  ;;  %v3350_v8 = vld [vmem:[%s5064_s4] ss:$0 sm:$0xff]  ;;  %s4187_s0 = smov 64  }
   0x4   :  { %3699 = vmatprep.subr.mxu1 %v4243_v1  ;;  %v4337_v26 = vld [vmem:[%s5065_s1 + $0x8] sm:$0xff]  ;;  %v4342_v29 = vld [vmem:[%s5065_s1] sm:$0xff]  ;;  %v4348_v33 = vld [vmem:[%s5065_s1 + $0x18] sm:$0xff] }
   0x5   :  { %3700 = vmatpush3.msra.mxu1 %v4243_v1  ;;  %v4357_v41 = vld [vmem:[%s5065_s1 + $0x10] sm:$0xff] }
   0x6   :  { %3701 = vmatprep.subr.mxu1 %v4255_v3 }
   0x7   :  { %3702 = vmatpush3.msra.mxu1 %v4255_v3 }
   0x8   :  { %3703 = vmatprep.subr.mxu1 %v4264_v4 }
   0x9   :  { %3704 = vmatpush3.msra.mxu1 %v4264_v4 }
   0xa   :  { %3706 = vmatmul.mubr.msk.f32.vlgmr.msra.gmra.mxu1 %vm66_vm0, %v4271_v5 }
   0xb   :  { %3708 = vmatprep.mubr.msk.f32.mxu1 %vm66_vm0, %v4277_v6 }
   0xe   :  { %3709 = vmatmul.mubr.msk.f32.gmra.mxu1 %vm66_vm0, %v4287_v7 }
  0xca   :  { %v3707_v9 = vpop.f32.mrf.mxu1 }
  0xcb   :  { %v4294_v10 = vadd.f32 %v3707_v9, %v3350_v8 }
  0xcc   :  { %v145_v11 = vpop.f32.mrf.mxu1 }
  0xcd   :  { %v4296_v12 = vadd.f32 %v3350_v8, %v145_v11  ;;  %170 = vrot.lane.b32.xlu1 %v4294_v10, %s4186_s19 }
  0xce   :  { %v3710_v13 = vpop.f32.mrf.mxu1 }
  0xcf   :  { %v4300_v14 = vadd.f32 %v3710_v13, %v3350_v8  ;;  %3719 = vmatprep.mubr.msk.f32.mxu1 %vm176_vm1, %v4296_v12 }
  0xd0   :  { %v155_v15 = vpop.f32.mrf.mxu1 }
  0xd1   :  { %174 = vrot.lane.b32.xlu0 %v4300_v14, %s4186_s19  ;;  %168 = vrot.lane.b32.xlu1 %v4296_v12, %s4186_s19  ;;  %v4308_v16 = vadd.f32 %v3350_v8, %v155_v15 }
  0xd5   :  { %172 = vrot.lane.b32.xlu0 %v4308_v16, %s4186_s19  ;;  %336 = vrot.lane.b32.xlu1 %v4300_v14, %s4187_s0 }
  0xd9   :  { %334 = vrot.lane.b32.xlu0 %v4308_v16, %s4187_s0  ;;  %332 = vrot.lane.b32.xlu1 %v4294_v10, %s4187_s0 }
  0xdd   :  { %330 = vrot.lane.b32.xlu1 %v4296_v12, %s4187_s0 }
 0x13f   :  { %v171_v17 = vpop.permute.xlu1 %170 }
 0x143   :  { %v175_v18 = vpop.permute.xlu0 %174  ;;  %v169_v19 = vpop.permute.xlu1 %168 }
 0x144   :  { %3711 = vmatprep.subr.msk.mxu1 %vm176_vm1, %v175_v18 }
 0x145   :  { %3712 = vmatpush3.xpose.msk.msra.mxu1 %vm176_vm1, %v175_v18 }
 0x147   :  { %v173_v20 = vpop.permute.xlu0 %172  ;;  %v337_v21 = vpop.permute.xlu1 %336 }
 0x148   :  { %3713 = vmatprep.subr.msk.mxu1 %vm176_vm1, %v173_v20  ;;  %3725 = vmatprep.subr.mxu0 %v337_v21 }
 0x149   :  { %3714 = vmatpush3.xpose.msk.msra.mxu1 %vm176_vm1, %v173_v20  ;;  %3726 = vmatpush3.msra.mxu0 %v337_v21 }
 0x14a   :  { %3715 = vmatprep.subr.msk.mxu1 %vm176_vm1, %v171_v17 }
 0x14b   :  { %v335_v22 = vpop.permute.xlu0 %334  ;;  %v333_v23 = vpop.permute.xlu1 %332 }
 0x14c   :  { %3727 = vmatprep.subr.mxu0 %v335_v22 }
 0x14d   :  { %3716 = vmatpush3.xpose.msk.msra.mxu1 %vm176_vm1, %v171_v17  ;;  %3728 = vmatpush3.msra.mxu0 %v335_v22 }
 0x14e   :  { %3717 = vmatprep.subr.msk.mxu1 %vm176_vm1, %v169_v19  ;;  %3729 = vmatprep.subr.mxu0 %v333_v23 }
 0x14f   :  { %3730 = vmatpush3.msra.mxu0 %v333_v23  ;;  %v331_v24 = vpop.permute.xlu1 %330 }
 0x150   :  { %3731 = vmatprep.subr.mxu0 %v331_v24 }
 0x151   :  { %3718 = vmatpush3.xpose.msk.msra.mxu1 %vm176_vm1, %v169_v19  ;;  %3732 = vmatpush3.msra.mxu0 %v331_v24 }
 0x154   :  { %3720 = vmatmul.mubr.msk.f32.vlgmr.msra.gmra.mxu1 %vm176_vm1, %v4294_v10 }
 0x155   :  { %3722 = vmatprep.mubr.msk.f32.mxu1 %vm176_vm1, %v4308_v16 }
 0x158   :  { %3723 = vmatmul.mubr.msk.f32.gmra.mxu1 %vm176_vm1, %v4300_v14 }
 0x214   :  { %v3721_v25 = vpop.f32.mrf.mxu1 }
 0x215   :  { %v279_v27 = vmul.f32 0.25, %v3721_v25 }
 0x216   :  { %v259_v28 = vpop.f32.mrf.mxu1 }
 0x217   :  { %v278_v30 = vmul.f32 0.25, %v259_v28  ;;  %v283_v31 = vadd.f32 %v279_v27, %v4337_v26 }
 0x218   :  { %v3724_v32 = vpop.f32.mrf.mxu1 }
 0x219   :  { %v281_v34 = vmul.f32 0.25, %v3724_v32  ;;  %v289_v35 = vsel %vm66_vm0, %v283_v31, -inf  ;;  %v282_v36 = vadd.f32 %v278_v30, %v4342_v29 }
 0x21a   :  { %290 = vmax.xlane.f32.xlu1 %v289_v35  ;;  %v269_v37 = vpop.f32.mrf.mxu1 }
 0x21b   :  { %v280_v38 = vmul.f32 0.25, %v269_v37  ;;  %v286_v39 = vsel %vm66_vm0, %v282_v36, -inf  ;;  %v285_v40 = vadd.f32 %v281_v34, %v4348_v33 }
 0x21c   :  { %287 = vmax.xlane.f32.xlu0 %v286_v39 }
 0x21d   :  { %v295_v42 = vsel %vm66_vm0, %v285_v40, -inf  ;;  %v284_v43 = vadd.f32 %v280_v38, %v4357_v41 }
 0x21f   :  { %v292_v44 = vsel %vm66_vm0, %v284_v43, -inf }
 0x220   :  { %296 = vmax.xlane.f32.xlu0 %v295_v42 }
 0x224   :  { %293 = vmax.xlane.f32.xlu0 %v292_v44 }
 0x22b   :  { %451 = vrot.lane.b32.xlu1 %v4308_v16, %s4188_s28 }
 0x23a   :  { %453 = vrot.lane.b32.xlu0 %v4300_v14, %s4188_s28 }
 0x2a3   :  { %v291_v45 = vpop.xlane.xlu1 %290 }
 0x2a4   :  { %v299_v46 = vsub.f32 %v283_v31, %v291_v45 }
 0x2a5   :  { %v288_v47 = vpop.xlane.xlu0 %287 }
 0x2a6   :  { %v304_v48 = vmul.f32 1.442695, %v299_v46  ;;  %v298_v49 = vsub.f32 %v282_v36, %v288_v47 }
 0x2a7   :  { %v452_v11 = vpop.permute.xlu1 %451 }
 0x2a8   :  { %4062 = vpow2.f32 %v304_v48  ;;  %v302_v50 = vmul.f32 1.442695, %v298_v49 }
 0x2a9   :  { %v297_v51 = vpop.xlane.xlu0 %296 }
 0x2aa   :  { %4064 = vpow2.f32 %v302_v50  ;;  %v301_v58 = vsub.f32 %v285_v40, %v297_v51 }
 0x2ac   :  { %v308_v60 = vmul.f32 1.442695, %v301_v58 }
 0x2ad   :  { %v294_v52 = vpop.xlane.xlu0 %293 }
 0x2ae   :  { %v300_v59 = vsub.f32 %v284_v43, %v294_v52  ;;  %4066 = vpow2.f32 %v308_v60 }
 0x2b0   :  { %v306_v61 = vmul.f32 1.442695, %v300_v59 }
 0x2b1   :  { %v454_v53 = vpop.permute.xlu0 %453 }
 0x2b2   :  { %3739 = vmatprep.subr.msk.mxu0 %vm176_vm1, %v454_v53  ;;  %4068 = vpow2.f32 %v306_v61 }
 0x2b5   :  { %v4063_v54 = vpop.eup %4062 }
 0x2b6   :  { %v313_v55 = vsel %vm66_vm0, %v4063_v54, 0.0 }
 0x2b7   :  { %v4065_v56 = vpop.eup %4064  ;;  %314 = vadd.xlane.f32.xlu0 %v313_v55 }
 0x2b8   :  { %v310_v57 = vsel %vm66_vm0, %v4065_v56, 0.0 }
 0x2b9   :  { %311 = vadd.xlane.f32.xlu1 %v310_v57 }
 0x2bb   :  { %v4067_v62 = vpop.eup %4066 }
 0x2bc   :  { %v319_v8 = vsel %vm66_vm0, %v4067_v62, 0.0 }
 0x2bf   :  { %v4069_v63 = vpop.eup %4068 }
 0x2c0   :  { %v316_v9 = vsel %vm66_vm0, %v4069_v63, 0.0 }
 0x2ca   :  { %447 = vrot.lane.b32.xlu1 %v4296_v12, %s4188_s28 }
 0x2cd   :  { %449 = vrot.lane.b32.xlu0 %v4294_v10, %s4188_s28 }
 0x2ec   :  { %320 = vadd.xlane.f32.xlu0 %v319_v8 }
 0x2ee   :  { %317 = vadd.xlane.f32.xlu1 %v316_v9 }
 0x2ff   :  { %441 = vrot.lane.b32.xlu1 %v4294_v10, %s4189_s29 }
 0x302   :  { %439 = vrot.lane.b32.xlu0 %v4296_v12, %s4189_s29 }
 0x303   :  { %445 = vrot.lane.b32.xlu1 %v4300_v14, %s4189_s29 }
 0x306   :  { %443 = vrot.lane.b32.xlu0 %v4308_v16, %s4189_s29 }
 0x340   :  { %v315_v13 = vpop.xlane.xlu0 %314 }
 0x341   :  { %4070 = vrcp.f32 %v315_v13 }
 0x342   :  { %v312_v15 = vpop.xlane.xlu1 %311 }
 0x343   :  { %4072 = vrcp.f32 %v312_v15 }
 0x344   :  { %v450_v21 = vpop.permute.xlu0 %449 }
 0x346   :  { %v448_v22 = vpop.permute.xlu1 %447 }
 0x34e   :  { %v4071_v17 = vpop.eup %4070 }
 0x34f   :  { %v325_v20 = vmul.f32 %v4071_v17, %v4063_v54 }
 0x350   :  { %v4073_v18 = vpop.eup %4072 }
 0x351   :  { %v323_v19 = vmul.f32 %v4073_v18, %v4065_v56 }
 0x353   :  { %3733 = vmatprep.mubr.msk.f32.mxu0 %vm66_vm0, %v323_v19 }
 0x354   :  { %3734 = vmatmul.mubr.msk.f32.vlgmr.msra.gmra.mxu0 %vm66_vm0, %v325_v20 }
 0x355   :  { %3740 = vmatpush3.xpose.msk.msra.mxu0 %vm176_vm1, %v454_v53 }
 0x356   :  { %3741 = vmatprep.subr.msk.mxu0 %vm176_vm1, %v452_v11 }
 0x359   :  { %3742 = vmatpush3.xpose.msk.msra.mxu0 %vm176_vm1, %v452_v11 }
 0x35a   :  { %3743 = vmatprep.subr.msk.mxu0 %vm176_vm1, %v450_v21 }
 0x35d   :  { %3744 = vmatpush3.xpose.msk.msra.mxu0 %vm176_vm1, %v450_v21 }
 0x35e   :  { %3745 = vmatprep.subr.msk.mxu0 %vm176_vm1, %v448_v22 }
 0x361   :  { %3746 = vmatpush3.xpose.msk.msra.mxu0 %vm176_vm1, %v448_v22 }
 0x375   :  { %v321_v23 = vpop.xlane.xlu0 %320 }
 0x376   :  { %4074 = vrcp.f32 %v321_v23 }
 0x377   :  { %v318_v24 = vpop.xlane.xlu1 %317 }
 0x378   :  { %4076 = vrcp.f32 %v318_v24 }
 0x379   :  { %v440_v30 = vpop.permute.xlu0 %439 }
 0x37b   :  { %v442_v32 = vpop.permute.xlu1 %441 }
 0x37d   :  { %v444_v34 = vpop.permute.xlu0 %443 }
 0x37f   :  { %v446_v35 = vpop.permute.xlu1 %445 }
 0x383   :  { %v4075_v25 = vpop.eup %4074 }
 0x384   :  { %v329_v31 = vmul.f32 %v4075_v25, %v4067_v62 }
 0x385   :  { %v4077_v27 = vpop.eup %4076 }
 0x386   :  { %v327_v28 = vmul.f32 %v4077_v27, %v4069_v63 }
 0x388   :  { %3736 = vmatprep.mubr.msk.f32.mxu0 %vm66_vm0, %v327_v28 }
 0x389   :  { %3737 = vmatmul.mubr.msk.f32.gmra.mxu0 %vm66_vm0, %v329_v31 }
 0x38a   :  { %3747 = vmatprep.mubr.msk.f32.mxu0 %vm176_vm1, %v440_v30 }
 0x38d   :  { %3748 = vmatmul.mubr.msk.f32.vlgmr.msra.gmra.mxu0 %vm176_vm1, %v442_v32 }
 0x38e   :  { %3750 = vmatprep.mubr.msk.f32.mxu0 %vm176_vm1, %v444_v34 }
 0x391   :  { %3751 = vmatmul.mubr.msk.f32.gmra.mxu0 %vm176_vm1, %v446_v35 }
 0x414   :  { %v4398_v36 = vpop.f32.mrf.mxu0 }
 0x416   :  { %v4400_v37 = vpop.f32.mrf.mxu0 }
 0x449   :  { %v4402_v38 = vpop.f32.mrf.mxu0 }
 0x44b   :  { %v4404_v39 = vpop.f32.mrf.mxu0 }
 0x44d   :  { %v3749_v40 = vpop.f32.mrf.mxu0 }
 0x44e   :  { %v557_v42 = vmul.f32 0.25, %v3749_v40 }
 0x44f   :  { %v537_v43 = vpop.f32.mrf.mxu0 }
 0x450   :  { %v556_v44 = vmul.f32 0.25, %v537_v43  ;;  %v561_v45 = vadd.f32 %v557_v42, %v4337_v26 }
 0x451   :  { %v3752_v46 = vpop.f32.mrf.mxu0 }
 0x452   :  { %v567_v47 = vsel %vm66_vm0, %v561_v45, -inf  ;;  %v560_v48 = vadd.f32 %v556_v44, %v4342_v29  ;;  %v559_v50 = vmul.f32 0.25, %v3752_v46 }
 0x453   :  { %568 = vmax.xlane.f32.xlu1 %v567_v47  ;;  %v547_v49 = vpop.f32.mrf.mxu0 }
 0x454   :  { %v558_v51 = vmul.f32 0.25, %v547_v49  ;;  %v564_v52 = vsel %vm66_vm0, %v560_v48, -inf  ;;  %v563_v55 = vadd.f32 %v559_v50, %v4348_v33 }
 0x455   :  { %565 = vmax.xlane.f32.xlu0 %v564_v52 }
 0x456   :  { %v562_v53 = vadd.f32 %v558_v51, %v4357_v41  ;;  %v573_v26 = vsel %vm66_vm0, %v563_v55, -inf }
 0x458   :  { %v570_v54 = vsel %vm66_vm0, %v562_v53, -inf }
 0x459   :  { %571 = vmax.xlane.f32.xlu0 %v570_v54 }
 0x45d   :  { %574 = vmax.xlane.f32.xlu0 %v573_v26 }
 0x464   :  { %614 = vrot.lane.b32.xlu1 %v4300_v14, %s4190_s30 }
 0x4dc   :  { %v569_v29 = vpop.xlane.xlu1 %568 }
 0x4dd   :  { %v577_v56 = vsub.f32 %v561_v45, %v569_v29 }
 0x4de   :  { %v566_v57 = vpop.xlane.xlu0 %565 }
 0x4df   :  { %v582_v58 = vmul.f32 1.442695, %v577_v56  ;;  %v576_v59 = vsub.f32 %v560_v48, %v566_v57 }
 0x4e0   :  { %v615_v60 = vpop.permute.xlu1 %614 }
 0x4e1   :  { %4078 = vpow2.f32 %v582_v58  ;;  %v580_v41 = vmul.f32 1.442695, %v576_v59  ;;  %3753 = vmatprep.subr.mxu1 %v615_v60 }
 0x4e2   :  { %3754 = vmatpush3.msra.mxu1 %v615_v60  ;;  %v572_v61 = vpop.xlane.xlu0 %571 }
 0x4e3   :  { %4080 = vpow2.f32 %v580_v41  ;;  %v578_v17 = vsub.f32 %v562_v53, %v572_v61 }
 0x4e5   :  { %v584_v18 = vmul.f32 1.442695, %v578_v17 }
 0x4e6   :  { %v575_v33 = vpop.xlane.xlu0 %574 }
 0x4e7   :  { %v579_v62 = vsub.f32 %v563_v55, %v575_v33 }
 0x4e9   :  { %v586_v63 = vmul.f32 1.442695, %v579_v62 }
 0x4eb   :  { %4082 = vpow2.f32 %v586_v63 }
 0x4ec   :  { %4084 = vpow2.f32 %v584_v18 }
 0x4ee   :  { %v4079_v8 = vpop.eup %4078 }
 0x4ef   :  { %v591_v9 = vsel %vm66_vm0, %v4079_v8, 0.0 }
 0x4f0   :  { %v4081_v14 = vpop.eup %4080  ;;  %592 = vadd.xlane.f32.xlu0 %v591_v9 }
 0x4f1   :  { %v588_v11 = vsel %vm66_vm0, %v4081_v14, 0.0 }
 0x4f2   :  { %589 = vadd.xlane.f32.xlu1 %v588_v11 }
 0x4f8   :  { %v4083_v13 = vpop.eup %4082 }
 0x4f9   :  { %v597_v15 = vsel %vm66_vm0, %v4083_v13, 0.0  ;;  %v4085_v19 = vpop.eup %4084 }
 0x4fa   :  { %598 = vadd.xlane.f32.xlu0 %v597_v15  ;;  %v594_v20 = vsel %vm66_vm0, %v4085_v19, 0.0 }
 0x503   :  { %610 = vrot.lane.b32.xlu1 %v4294_v10, %s4190_s30 }
 0x510   :  { %612 = vrot.lane.b32.xlu0 %v4308_v16, %s4190_s30 }
 0x514   :  { %751 = vrot.lane.b32.xlu0 %v4238_v0, %s4191_s8 }
 0x518   :  { %747 = vrot.lane.b32.xlu0 %v4255_v3, %s4191_s8 }
 0x51c   :  { %745 = vrot.lane.b32.xlu0 %v4264_v4, %s4191_s8 }
 0x527   :  { %595 = vadd.xlane.f32.xlu1 %v594_v20 }
 0x538   :  { %608 = vrot.lane.b32.xlu1 %v4296_v12, %s4190_s30 }
 0x53c   :  { %749 = vrot.lane.b32.xlu1 %v4243_v1, %s4191_s8 }
 0x579   :  { %v593_v16 = vpop.xlane.xlu0 %592 }
 0x57b   :  { %v590_v10 = vpop.xlane.xlu1 %589 }
 0x57c   :  { %4086 = vrcp.f32 %v590_v10 }
 0x57d   :  { %4088 = vrcp.f32 %v593_v16 }
 0x57f   :  { %v611_v23 = vpop.permute.xlu1 %610 }
 0x583   :  { %v599_v21 = vpop.xlane.xlu0 %598 }
 0x584   :  { %4090 = vrcp.f32 %v599_v21 }
 0x587   :  { %v613_v22 = vpop.permute.xlu0 %612 }
 0x588   :  { %3755 = vmatprep.subr.mxu1 %v613_v22 }
 0x589   :  { %v4087_v12 = vpop.eup %4086  ;;  %3756 = vmatpush3.msra.mxu1 %v613_v22 }
 0x58a   :  { %3757 = vmatprep.subr.mxu1 %v611_v23  ;;  %v601_v0 = vmul.f32 %v4087_v12, %v4081_v14  ;;  %v4089_v3 = vpop.eup %4088  ;;  %v53_v12 = vld [vmem:[%s5066_s5 + $0x18] sm:$0xff] }
 0x58b   :  { %3758 = vmatpush3.msra.mxu1 %v611_v23  ;;  %v603_v24 = vmul.f32 %v4089_v3, %v4079_v8  ;;  %v752_v31 = vpop.permute.xlu0 %751  ;;  %v52_v23 = vld [vmem:[%s5066_s5 + $0x10] sm:$0xff]  ;;  %3781 = vmatprep.subr.mxu0 %v53_v12 }
 0x58c   :  { %3761 = vmatprep.mubr.msk.f32.mxu1 %vm66_vm0, %v601_v0  ;;  %3782 = vmatpush3.msra.mxu0 %v53_v12  ;;  %v51_v0 = vld [vmem:[%s5066_s5 + $0x8] sm:$0xff] }
 0x58d   :  { %3783 = vmatprep.subr.mxu0 %v52_v23 }
 0x58e   :  { %3784 = vmatpush3.msra.mxu0 %v52_v23 }
 0x58f   :  { %v748_v34 = vpop.permute.xlu0 %747  ;;  %3785 = vmatprep.subr.mxu0 %v51_v0 }
 0x590   :  { %3786 = vmatpush3.msra.mxu0 %v51_v0 }
 0x591   :  { %v4091_v25 = vpop.eup %4090 }
 0x592   :  { %v607_v30 = vmul.f32 %v4091_v25, %v4083_v13 }
 0x593   :  { %v746_v35 = vpop.permute.xlu0 %745 }
 0x5b0   :  { %v596_v1 = vpop.xlane.xlu1 %595 }
 0x5b1   :  { %4092 = vrcp.f32 %v596_v1  ;;  %v50_v1 = vld [vmem:[%s5066_s5] sm:$0xff] }
 0x5b2   :  { %3787 = vmatprep.subr.mxu0 %v50_v1 }
 0x5b3   :  { %3788 = vmatpush3.msra.mxu0 %v50_v1 }
 0x5b4   :  { %v609_v4 = vpop.permute.xlu1 %608 }
 0x5b5   :  { %3759 = vmatprep.subr.mxu1 %v609_v4 }
 0x5b6   :  { %3760 = vmatpush3.msra.mxu1 %v609_v4 }
 0x5b7   :  { %3762 = vmatmul.mubr.msk.f32.vlgmr.msra.gmra.mxu1 %vm66_vm0, %v603_v24  ;;  %3767 = vmatprep.subr.mxu1 %v752_v31 }
 0x5b8   :  { %v750_v32 = vpop.permute.xlu1 %749  ;;  %3768 = vmatpush3.msra.mxu1 %v752_v31 }
 0x5b9   :  { %3769 = vmatprep.subr.mxu1 %v750_v32 }
 0x5ba   :  { %3770 = vmatpush3.msra.mxu1 %v750_v32 }
 0x5bb   :  { %3771 = vmatprep.subr.mxu1 %v748_v34 }
 0x5bc   :  { %3772 = vmatpush3.msra.mxu1 %v748_v34 }
 0x5bd   :  { %3773 = vmatprep.subr.mxu1 %v746_v35 }
 0x5be   :  { %v4093_v27 = vpop.eup %4092  ;;  %3774 = vmatpush3.msra.mxu1 %v746_v35 }
 0x5bf   :  { %v605_v28 = vmul.f32 %v4093_v27, %v4085_v19 }
 0x5c1   :  { %3764 = vmatprep.mubr.msk.f32.mxu1 %vm66_vm0, %v605_v28 }
 0x5c2   :  { %3765 = vmatmul.mubr.msk.f32.gmra.mxu1 %vm66_vm0, %v607_v30 }
 0x677   :  { %v3763_v40 = vpop.f32.mrf.mxu1 }
 0x679   :  { %v698_v42 = vpop.f32.mrf.mxu1 }
 0x67a   :  { %721 = vrot.lane.b32.xlu1 %v698_v42, %s4192_s9 }
 0x67e   :  { %723 = vrot.lane.b32.xlu1 %v3763_v40, %s4192_s9 }
 0x682   :  { %v3766_v43 = vpop.f32.mrf.mxu1 }
 0x683   :  { %727 = vrot.lane.b32.xlu1 %v3766_v43, %s4192_s9 }
 0x684   :  { %v708_v44 = vpop.f32.mrf.mxu1 }
 0x685   :  { %725 = vrot.lane.b32.xlu0 %v708_v44, %s4192_s9  ;;  %v3384_v44 = vld [vmem:[%s5064_s4 + $0x2] ss:$0 sm:$0xff] }
 0x6ec   :  { %v722_v45 = vpop.permute.xlu1 %721 }
 0x6ed   :  { %v733_v46 = vsel %vm176_vm1, %v4400_v37, %v722_v45  ;;  %v3379_v37 = vld [vmem:[%s5064_s4 + $0x1] ss:$0 sm:$0xff] }
 0x6ee   :  { %3775 = vmatprep.mubr.msk.f32.mxu1 %vm66_vm0, %v733_v46 }
 0x6f0   :  { %v724_v47 = vpop.permute.xlu1 %723 }
 0x6f1   :  { %v734_v48 = vsel %vm176_vm1, %v4398_v36, %v724_v47 }
 0x6f2   :  { %3776 = vmatmul.mubr.msk.f32.vlgmr.msra.gmra.mxu1 %vm66_vm0, %v734_v48  ;;  %v3385_v48 = vld [vmem:[%s5064_s4 + $0x3] ss:$0 sm:$0xff] }
 0x6f5   :  { %v728_v49 = vpop.permute.xlu1 %727 }
 0x6f6   :  { %v736_v52 = vsel %vm176_vm1, %v4402_v38, %v728_v49 }
 0x6f7   :  { %v726_v50 = vpop.permute.xlu0 %725 }
 0x6f8   :  { %v735_v51 = vsel %vm176_vm1, %v4404_v39, %v726_v50 }
 0x6f9   :  { %3778 = vmatprep.mubr.msk.f32.mxu1 %vm66_vm0, %v735_v51 }
 0x6fa   :  { %3779 = vmatmul.mubr.msk.f32.gmra.mxu1 %vm66_vm0, %v736_v52 }
 0x7b2   :  { %v3777_v53 = vpop.f32.mrf.mxu1 }
 0x7b3   :  { %v841_v36 = vadd.f32 %v3777_v53, %v3379_v37 }
 0x7b4   :  { %v835_v54 = vpop.f32.mrf.mxu1 }
 0x7b5   :  { %v836_v55 = vadd.f32 %v3379_v37, %v835_v54  ;;  %v855_v26 = vadd.f32 %v841_v36, %v4271_v5 }
 0x7b7   :  { %v861_v29 = vsel %vm66_vm0, %v855_v26, 0.0  ;;  %v854_v39 = vadd.f32 %v836_v55, %v4249_v2 }
 0x7b8   :  { %862 = vadd.xlane.f32.xlu1 %v861_v29 }
 0x7b9   :  { %v858_v38 = vsel %vm66_vm0, %v854_v39, 0.0 }
 0x7ba   :  { %859 = vadd.xlane.f32.xlu0 %v858_v38  ;;  %v3780_v56 = vpop.f32.mrf.mxu1  ;;  %v60_v38 = vld [vmem:[%s5066_s5 + $0x50] sm:$0xff] }
 0x7bb   :  { %v851_v58 = vadd.f32 %v3780_v56, %v3379_v37  ;;  %v59_v56 = vld [vmem:[%s5066_s5 + $0x48] sm:$0xff] }
 0x7bc   :  { %v845_v57 = vpop.f32.mrf.mxu1 }
 0x7bd   :  { %v846_v59 = vadd.f32 %v3379_v37, %v845_v57  ;;  %v857_v61 = vadd.f32 %v851_v58, %v4287_v7  ;;  %v58_v57 = vld [vmem:[%s5066_s5 + $0x40] sm:$0xff]  ;;  %v57_v58 = vld [vmem:[%s5066_s5 + $0x38] sm:$0xff] }
 0x7bf   :  { %v856_v60 = vadd.f32 %v846_v59, %v4277_v6  ;;  %v867_v5 = vsel %vm66_vm0, %v857_v61, 0.0  ;;  %v56_v59 = vld [vmem:[%s5066_s5 + $0x30] sm:$0xff] }
 0x7c1   :  { %v864_v41 = vsel %vm66_vm0, %v856_v60, 0.0 }
 0x7c2   :  { %865 = vadd.xlane.f32.xlu0 %v864_v41  ;;  %v54_v41 = vld [vmem:[%s5066_s5 + $0x20] sm:$0xff] }
 0x7c6   :  { %868 = vadd.xlane.f32.xlu0 %v867_v5 }
 0x841   :  { %v863_v33 = vpop.xlane.xlu1 %862 }
 0x842   :  { %v872_v2 = vmul.f32 0.03125, %v863_v33 }
 0x843   :  { %v860_v62 = vpop.xlane.xlu0 %859 }
 0x844   :  { %v876_v63 = vsub.f32 %v855_v26, %v872_v2  ;;  %v871_v8 = vmul.f32 0.03125, %v860_v62 }
 0x846   :  { %v875_v9 = vsub.f32 %v854_v39, %v871_v8  ;;  %v880_v14 = vmul.f32 %v876_v63, %v876_v63  ;;  %v61_v39 = vld [vmem:[%s5066_s5 + $0x58] sm:$0xff] }
 0x847   :  { %3795 = vmatprep.subr.mxu1 %v61_v39 }
 0x848   :  { %v886_v11 = vsel %vm66_vm0, %v880_v14, 0.0  ;;  %v879_v13 = vmul.f32 %v875_v9, %v875_v9  ;;  %3796 = vmatpush3.msra.mxu1 %v61_v39 }
 0x849   :  { %887 = vadd.xlane.f32.xlu0 %v886_v11  ;;  %3797 = vmatprep.subr.mxu1 %v60_v38 }
 0x84a   :  { %v883_v6 = vsel %vm66_vm0, %v879_v13, 0.0  ;;  %3798 = vmatpush3.msra.mxu1 %v60_v38 }
 0x84b   :  { %884 = vadd.xlane.f32.xlu1 %v883_v6  ;;  %v866_v15 = vpop.xlane.xlu0 %865  ;;  %3799 = vmatprep.subr.mxu1 %v59_v56 }
 0x84c   :  { %v873_v7 = vmul.f32 0.03125, %v866_v15  ;;  %3800 = vmatpush3.msra.mxu1 %v59_v56 }
 0x84d   :  { %3801 = vmatprep.subr.mxu1 %v58_v57 }
 0x84e   :  { %v877_v17 = vsub.f32 %v856_v60, %v873_v7  ;;  %3802 = vmatpush3.msra.mxu1 %v58_v57  ;;  %v55_v60 = vld [vmem:[%s5066_s5 + $0x28] sm:$0xff] }
 0x84f   :  { %v869_v18 = vpop.xlane.xlu0 %868  ;;  %3803 = vmatprep.subr.mxu1 %v57_v58 }
 0x850   :  { %v874_v19 = vmul.f32 0.03125, %v869_v18  ;;  %v881_v20 = vmul.f32 %v877_v17, %v877_v17  ;;  %3804 = vmatpush3.msra.mxu1 %v57_v58 }
 0x851   :  { %3805 = vmatprep.subr.mxu1 %v56_v59 }
 0x852   :  { %v878_v10 = vsub.f32 %v857_v61, %v874_v19  ;;  %v889_v16 = vsel %vm66_vm0, %v881_v20, 0.0  ;;  %3806 = vmatpush3.msra.mxu1 %v56_v59  ;;  %v3386_v61 = vld [vmem:[%s5064_s4 + $0x4] ss:$0 sm:$0xff] }
 0x853   :  { %890 = vadd.xlane.f32.xlu1 %v889_v16  ;;  %3807 = vmatprep.subr.mxu1 %v55_v60 }
 0x854   :  { %v882_v21 = vmul.f32 %v878_v10, %v878_v10  ;;  %3808 = vmatpush3.msra.mxu1 %v55_v60 }
 0x855   :  { %3809 = vmatprep.subr.mxu1 %v54_v41 }
 0x856   :  { %v892_v22 = vsel %vm66_vm0, %v882_v21, 0.0  ;;  %3810 = vmatpush3.msra.mxu1 %v54_v41 }
 0x857   :  { %893 = vadd.xlane.f32.xlu0 %v892_v22 }
 0x8d2   :  { %v888_v3 = vpop.xlane.xlu0 %887 }
 0x8d3   :  { %v896_v4 = vmul.f32 0.03125, %v888_v3 }
 0x8d4   :  { %v885_v24 = vpop.xlane.xlu1 %884 }
 0x8d5   :  { %v900_v25 = vadd.f32 1e-06, %v896_v4  ;;  %v895_v27 = vmul.f32 0.03125, %v885_v24 }
 0x8d7   :  { %4094 = vrsqrt.f32 %v900_v25  ;;  %v899_v28 = vadd.f32 1e-06, %v895_v27 }
 0x8d9   :  { %4096 = vrsqrt.f32 %v899_v28 }
 0x8dc   :  { %v891_v30 = vpop.xlane.xlu1 %890 }
 0x8dd   :  { %v897_v31 = vmul.f32 0.03125, %v891_v30 }
 0x8df   :  { %v901_v32 = vadd.f32 1e-06, %v897_v31 }
 0x8e0   :  { %v894_v34 = vpop.xlane.xlu0 %893 }
 0x8e1   :  { %4098 = vrsqrt.f32 %v901_v32  ;;  %v898_v35 = vmul.f32 0.03125, %v894_v34 }
 0x8e3   :  { %v902_v40 = vadd.f32 1e-06, %v898_v35 }
 0x8e4   :  { %v4095_v42 = vpop.eup %4094 }
 0x8e5   :  { %v908_v43 = vmul.f32 %v4095_v42, %v876_v63  ;;  %4100 = vrsqrt.f32 %v902_v40 }
 0x8e6   :  { %v4097_v45 = vpop.eup %4096 }
 0x8e7   :  { %v907_v46 = vmul.f32 %v4097_v45, %v875_v9  ;;  %v916_v47 = vmul.f32 %v3384_v44, %v908_v43 }
 0x8e9   :  { %v915_v49 = vmul.f32 %v3384_v44, %v907_v46  ;;  %v4489_v51 = vadd.f32 %v3385_v48, %v916_v47 }
 0x8eb   :  { %v4487_v50 = vadd.f32 %v3385_v48, %v915_v49  ;;  %v3391_v49 = vld [vmem:[%s5064_s4 + $0x5] ss:$0 sm:$0xff] }
 0x8ed   :  { %3789 = vmatprep.mubr.msk.f32.mxu0 %vm66_vm0, %v4487_v50 }
 0x8ee   :  { %v4099_v52 = vpop.eup %4098  ;;  %3790 = vmatmul.mubr.msk.f32.vlgmr.msra.gmra.mxu0 %vm66_vm0, %v4489_v51 }
 0x8ef   :  { %v909_v37 = vmul.f32 %v4099_v52, %v877_v17 }
 0x8f1   :  { %v917_v53 = vmul.f32 %v3384_v44, %v909_v37 }
 0x8f2   :  { %v4101_v36 = vpop.eup %4100 }
 0x8f3   :  { %v4495_v54 = vadd.f32 %v3385_v48, %v917_v53  ;;  %v910_v55 = vmul.f32 %v4101_v36, %v878_v10 }
 0x8f5   :  { %3792 = vmatprep.mubr.msk.f32.mxu0 %vm66_vm0, %v4495_v54  ;;  %v918_v26 = vmul.f32 %v3384_v44, %v910_v55 }
 0x8f7   :  { %v4499_v29 = vadd.f32 %v3385_v48, %v918_v26 }
 0x8f9   :  { %3793 = vmatmul.mubr.msk.f32.gmra.mxu0 %vm66_vm0, %v4499_v29 }
 0x9ae   :  { %v3791_v5 = vpop.f32.mrf.mxu0 }
 0x9af   :  { %v1015_v33 = vadd.f32 %v3791_v5, %v3386_v61 }
 0x9b0   :  { %v1009_v2 = vpop.f32.mrf.mxu0 }
 0x9b1   :  { %v1033_v62 = vmul.f32 0.044715, %v1015_v33  ;;  %v1010_v63 = vadd.f32 %v3386_v61, %v1009_v2  ;;  %v1029_v32 = vmul.f32 0.5, %v1015_v33 }
 0x9b3   :  { %v1037_v8 = vmul.f32 %v1033_v62, %v1015_v33  ;;  %v1032_v9 = vmul.f32 0.044715, %v1010_v63  ;;  %v1028_v30 = vmul.f32 0.5, %v1010_v63 }
 0x9b5   :  { %v1041_v14 = vmul.f32 %v1037_v8, %v1015_v33  ;;  %v1036_v11 = vmul.f32 %v1032_v9, %v1010_v63 }
 0x9b7   :  { %v1045_v13 = vadd.f32 %v1041_v14, %v1015_v33  ;;  %v1040_v6 = vmul.f32 %v1036_v11, %v1010_v63 }
 0x9b9   :  { %v1049_v15 = vmul.f32 0.7978846, %v1045_v13  ;;  %v1044_v7 = vadd.f32 %v1040_v6, %v1010_v63  ;;  %v3794_v17 = vpop.f32.mrf.mxu0 }
 0x9ba   :  { %v1025_v18 = vadd.f32 %v3794_v17, %v3386_v61 }
 0x9bb   :  { %4102 = vtanh.f32 %v1049_v15  ;;  %v1019_v19 = vpop.f32.mrf.mxu0  ;;  %v1048_v20 = vmul.f32 0.7978846, %v1044_v7 }
 0x9bc   :  { %v1035_v10 = vmul.f32 0.044715, %v1025_v18  ;;  %v1020_v16 = vadd.f32 %v3386_v61, %v1019_v19  ;;  %v1031_v46 = vmul.f32 0.5, %v1025_v18 }
 0x9bd   :  { %4104 = vtanh.f32 %v1048_v20 }
 0x9be   :  { %v1039_v21 = vmul.f32 %v1035_v10, %v1025_v18  ;;  %v1034_v22 = vmul.f32 0.044715, %v1020_v16  ;;  %v1030_v44 = vmul.f32 0.5, %v1020_v16  ;;  %v4552_v10 = vld [vmem:[%s5062_s3 + $0x38] sm:$0xff] }
 0x9bf   :  { %3817 = vmatprep.subr.mxu0 %v4552_v10 }
 0x9c0   :  { %v1043_v12 = vmul.f32 %v1039_v21, %v1025_v18  ;;  %v1038_v23 = vmul.f32 %v1034_v22, %v1020_v16  ;;  %3818 = vmatpush3.msra.mxu0 %v4552_v10  ;;  %v4564_v21 = vld [vmem:[%s5062_s3 + $0x28] sm:$0xff]  ;;  %v4571_v22 = vld [vmem:[%s5062_s3 + $0x20] sm:$0xff] }
 0x9c2   :  { %v1047_v0 = vadd.f32 %v1043_v12, %v1025_v18  ;;  %v1042_v1 = vmul.f32 %v1038_v23, %v1020_v16 }
 0x9c4   :  { %v1046_v3 = vadd.f32 %v1042_v1, %v1020_v16  ;;  %v1051_v4 = vmul.f32 0.7978846, %v1047_v0  ;;  %v4557_v16 = vld [vmem:[%s5062_s3 + $0x30] sm:$0xff] }
 0x9c5   :  { %3819 = vmatprep.subr.mxu0 %v4557_v16 }
 0x9c6   :  { %v1050_v24 = vmul.f32 0.7978846, %v1046_v3  ;;  %4106 = vtanh.f32 %v1051_v4  ;;  %3820 = vmatpush3.msra.mxu0 %v4557_v16 }
 0x9c7   :  { %3821 = vmatprep.subr.mxu0 %v4564_v21 }
 0x9c8   :  { %v4103_v25 = vpop.eup %4102  ;;  %4108 = vtanh.f32 %v1050_v24  ;;  %3822 = vmatpush3.msra.mxu0 %v4564_v21 }
 0x9c9   :  { %v1057_v28 = vadd.f32 1.0, %v4103_v25  ;;  %3823 = vmatprep.subr.mxu0 %v4571_v22 }
 0x9ca   :  { %v4105_v27 = vpop.eup %4104  ;;  %3824 = vmatpush3.msra.mxu0 %v4571_v22 }
 0x9cb   :  { %v1056_v31 = vadd.f32 1.0, %v4105_v27  ;;  %v1061_v35 = vmul.f32 %v1057_v28, %v1029_v32 }
 0x9cd   :  { %v1060_v34 = vmul.f32 %v1056_v31, %v1028_v30 }
 0x9cf   :  { %3811 = vmatprep.mubr.msk.f32.mxu1 %vm1068_vm2, %v1060_v34 }
 0x9d0   :  { %3812 = vmatmul.mubr.msk.f32.vlgmr.msra.gmra.mxu1 %vm1068_vm2, %v1061_v35  ;;  %v3396_v35 = vld [vmem:[%s5064_s4 + $0x6] ss:$0 sm:$0xff] }
 0x9d3   :  { %v4107_v40 = vpop.eup %4106 }
 0x9d4   :  { %v1059_v43 = vadd.f32 1.0, %v4107_v40 }
 0x9d5   :  { %v4109_v42 = vpop.eup %4108 }
 0x9d6   :  { %v1058_v45 = vadd.f32 1.0, %v4109_v42  ;;  %v1063_v48 = vmul.f32 %v1059_v43, %v1031_v46 }
 0x9d8   :  { %v1062_v47 = vmul.f32 %v1058_v45, %v1030_v44  ;;  %v3397_v44 = vld [vmem:[%s5064_s4 + $0x7] ss:$0 sm:$0xff] }
 0x9da   :  { %3814 = vmatprep.mubr.msk.f32.mxu1 %vm1068_vm2, %v1062_v47 }
 0x9db   :  { %3815 = vmatmul.mubr.msk.f32.gmra.mxu1 %vm1068_vm2, %v1063_v48 }
 0xa90   :  { %v3813_v52 = vpop.f32.mrf.mxu1 }
 0xa91   :  { %v1153_v37 = vadd.f32 %v3813_v52, %v3391_v49 }
 0xa92   :  { %v1147_v53 = vpop.f32.mrf.mxu1 }
 0xa93   :  { %v1148_v36 = vadd.f32 %v3391_v49, %v1147_v53  ;;  %v1167_v55 = vadd.f32 %v1153_v37, %v4489_v51 }
 0xa95   :  { %v1173_v26 = vsel %vm66_vm0, %v1167_v55, 0.0  ;;  %v1166_v39 = vadd.f32 %v1148_v36, %v4487_v50 }
 0xa96   :  { %1174 = vadd.xlane.f32.xlu0 %v1173_v26 }
 0xa97   :  { %v1170_v38 = vsel %vm66_vm0, %v1166_v39, 0.0 }
 0xa98   :  { %1171 = vadd.xlane.f32.xlu1 %v1170_v38  ;;  %v3422_v38 = vld [vmem:[%s5064_s4 + $0x8] ss:$0 sm:$0xff] }
 0xa9b   :  { %v3816_v56 = vpop.f32.mrf.mxu1 }
 0xa9c   :  { %v1163_v57 = vadd.f32 %v3816_v56, %v3391_v49 }
 0xa9d   :  { %v1157_v58 = vpop.f32.mrf.mxu1 }
 0xa9e   :  { %v1158_v59 = vadd.f32 %v3391_v49, %v1157_v58  ;;  %v1169_v60 = vadd.f32 %v1163_v57, %v4499_v29 }
 0xaa0   :  { %v1179_v41 = vsel %vm66_vm0, %v1169_v60, 0.0  ;;  %v1168_v61 = vadd.f32 %v1158_v59, %v4495_v54 }
 0xaa1   :  { %1180 = vadd.xlane.f32.xlu0 %v1179_v41 }
 0xaa2   :  { %v1176_v51 = vsel %vm66_vm0, %v1168_v61, 0.0 }
 0xaa3   :  { %1177 = vadd.xlane.f32.xlu1 %v1176_v51 }
 0xb1f   :  { %v1175_v5 = vpop.xlane.xlu0 %1174 }
 0xb20   :  { %v1183_v50 = vmul.f32 0.03125, %v1175_v5 }
 0xb21   :  { %v1172_v33 = vpop.xlane.xlu1 %1171 }
 0xb22   :  { %v1187_v2 = vsub.f32 %v1167_v55, %v1183_v50  ;;  %v1182_v62 = vmul.f32 0.03125, %v1172_v33 }
 0xb24   :  { %v1186_v63 = vsub.f32 %v1166_v39, %v1182_v62  ;;  %v1191_v8 = vmul.f32 %v1187_v2, %v1187_v2 }
 0xb26   :  { %v1197_v9 = vsel %vm66_vm0, %v1191_v8, 0.0  ;;  %v1190_v14 = vmul.f32 %v1186_v63, %v1186_v63 }
 0xb27   :  { %1198 = vadd.xlane.f32.xlu0 %v1197_v9 }
 0xb28   :  { %v1194_v29 = vsel %vm66_vm0, %v1190_v14, 0.0 }
 0xb29   :  { %1195 = vadd.xlane.f32.xlu1 %v1194_v29 }
 0xb2a   :  { %v1181_v11 = vpop.xlane.xlu0 %1180 }
 0xb2b   :  { %v1185_v54 = vmul.f32 0.03125, %v1181_v11 }
 0xb2c   :  { %v1178_v13 = vpop.xlane.xlu1 %1177 }
 0xb2d   :  { %v1189_v6 = vsub.f32 %v1169_v60, %v1185_v54  ;;  %v1184_v15 = vmul.f32 0.03125, %v1178_v13  ;;  %v4645_v54 = vld [vmem:[%s5065_s1 + $0x8] sm:$0xff] }
 0xb2f   :  { %v1188_v7 = vsub.f32 %v1168_v61, %v1184_v15  ;;  %v1193_v17 = vmul.f32 %v1189_v6, %v1189_v6 }
 0xb31   :  { %v1203_v18 = vsel %vm66_vm0, %v1193_v17, 0.0  ;;  %v1192_v19 = vmul.f32 %v1188_v7, %v1188_v7  ;;  %v4652_v17 = vld [vmem:[%s5065_s1] sm:$0xff] }
 0xb32   :  { %1204 = vadd.xlane.f32.xlu0 %v1203_v18 }
 0xb33   :  { %v1200_v20 = vsel %vm66_vm0, %v1192_v19, 0.0 }
 0xb34   :  { %1201 = vadd.xlane.f32.xlu1 %v1200_v20 }
 0xbb0   :  { %v1199_v12 = vpop.xlane.xlu0 %1198 }
 0xbb1   :  { %v1207_v23 = vmul.f32 0.03125, %v1199_v12 }
 0xbb2   :  { %v1196_v0 = vpop.xlane.xlu1 %1195 }
 0xbb3   :  { %v1211_v1 = vadd.f32 1e-06, %v1207_v23  ;;  %v1206_v3 = vmul.f32 0.03125, %v1196_v0  ;;  %v4659_v23 = vld [vmem:[%s5065_s1 + $0x18] sm:$0xff] }
 0xbb5   :  { %4110 = vrsqrt.f32 %v1211_v1  ;;  %v1210_v4 = vadd.f32 1e-06, %v1206_v3  ;;  %v4666_v3 = vld [vmem:[%s5065_s1 + $0x10] sm:$0xff] }
 0xbb7   :  { %4112 = vrsqrt.f32 %v1210_v4 }
 0xbbb   :  { %v1205_v24 = vpop.xlane.xlu0 %1204 }
 0xbbc   :  { %v1209_v25 = vmul.f32 0.03125, %v1205_v24 }
 0xbbd   :  { %v1202_v27 = vpop.xlane.xlu1 %1201 }
 0xbbe   :  { %v1213_v28 = vadd.f32 1e-06, %v1209_v25  ;;  %v1208_v30 = vmul.f32 0.03125, %v1202_v27 }
 0xbc0   :  { %4114 = vrsqrt.f32 %v1213_v28  ;;  %v1212_v31 = vadd.f32 1e-06, %v1208_v30 }
 0xbc2   :  { %v4111_v32 = vpop.eup %4110  ;;  %4116 = vrsqrt.f32 %v1212_v31 }
 0xbc3   :  { %v1219_v34 = vmul.f32 %v4111_v32, %v1187_v2 }
 0xbc4   :  { %v4113_v40 = vpop.eup %4112 }
 0xbc5   :  { %v1218_v42 = vmul.f32 %v4113_v40, %v1186_v63  ;;  %v1227_v43 = vmul.f32 %v3396_v35, %v1219_v34 }
 0xbc7   :  { %v1226_v45 = vmul.f32 %v3396_v35, %v1218_v42  ;;  %v4585_v47 = vadd.f32 %v3397_v44, %v1227_v43 }
 0xbc9   :  { %v4583_v46 = vadd.f32 %v3397_v44, %v1226_v45 }
 0xbcb   :  { %3825 = vmatprep.mubr.msk.f32.mxu0 %vm66_vm0, %v4583_v46 }
 0xbcc   :  { %3826 = vmatmul.mubr.msk.f32.vlgmr.msra.gmra.mxu0 %vm66_vm0, %v4585_v47 }
 0xbcd   :  { %v4115_v48 = vpop.eup %4114 }
 0xbce   :  { %v1221_v49 = vmul.f32 %v4115_v48, %v1189_v6 }
 0xbcf   :  { %v4117_v52 = vpop.eup %4116 }
 0xbd0   :  { %v1220_v37 = vmul.f32 %v4117_v52, %v1188_v7  ;;  %v1229_v53 = vmul.f32 %v3396_v35, %v1221_v49 }
 0xbd2   :  { %v1228_v36 = vmul.f32 %v3396_v35, %v1220_v37  ;;  %v4593_v26 = vadd.f32 %v3397_v44, %v1229_v53 }
 0xbd4   :  { %v4591_v55 = vadd.f32 %v3397_v44, %v1228_v36 }
 0xbd6   :  { %3828 = vmatprep.mubr.msk.f32.mxu0 %vm66_vm0, %v4591_v55 }
 0xbd7   :  { %3829 = vmatmul.mubr.msk.f32.gmra.mxu0 %vm66_vm0, %v4593_v26 }
 0xc8c   :  { %v3827_v39 = vpop.f32.mrf.mxu0 }
 0xc8d   :  { %v4612_v61 = vadd.f32 %v3827_v39, %v3422_v38 }
 0xc8e   :  { %v1347_v56 = vpop.f32.mrf.mxu0 }
 0xc8f   :  { %v4602_v57 = vadd.f32 %v3422_v38, %v1347_v56 }
 0xc91   :  { %3839 = vmatprep.mubr.msk.f32.mxu0 %vm176_vm1, %v4602_v57 }
 0xc97   :  { %v3830_v58 = vpop.f32.mrf.mxu0 }
 0xc98   :  { %v4606_v59 = vadd.f32 %v3830_v58, %v3422_v38 }
 0xc99   :  { %v1357_v60 = vpop.f32.mrf.mxu0 }
 0xc9a   :  { %v4608_v41 = vadd.f32 %v3422_v38, %v1357_v60  ;;  %1376 = vrot.lane.b32.xlu1 %v4606_v59, %s4186_s19 }
 0xc9c   :  { %1374 = vrot.lane.b32.xlu0 %v4608_v41, %s4186_s19 }
 0xc9e   :  { %1372 = vrot.lane.b32.xlu1 %v4612_v61, %s4186_s19 }
 0xca0   :  { %1535 = vrot.lane.b32.xlu0 %v4608_v41, %s4187_s0 }
 0xca2   :  { %1370 = vrot.lane.b32.xlu1 %v4602_v57, %s4186_s19 }
 0xca6   :  { %1537 = vrot.lane.b32.xlu1 %v4606_v59, %s4187_s0 }
 0xcaa   :  { %1533 = vrot.lane.b32.xlu1 %v4612_v61, %s4187_s0 }
 0xcae   :  { %1531 = vrot.lane.b32.xlu1 %v4602_v57, %s4187_s0 }
 0xd0c   :  { %v1377_v51 = vpop.permute.xlu1 %1376 }
 0xd0d   :  { %3831 = vmatprep.subr.msk.mxu0 %vm176_vm1, %v1377_v51 }
 0xd0e   :  { %3832 = vmatpush3.xpose.msk.msra.mxu0 %vm176_vm1, %v1377_v51  ;;  %v1375_v5 = vpop.permute.xlu0 %1374 }
 0xd0f   :  { %3833 = vmatprep.subr.msk.mxu0 %vm176_vm1, %v1375_v5 }
 0xd10   :  { %v1373_v50 = vpop.permute.xlu1 %1372 }
 0xd12   :  { %3834 = vmatpush3.xpose.msk.msra.mxu0 %vm176_vm1, %v1375_v5  ;;  %v1536_v62 = vpop.permute.xlu0 %1535 }
 0xd13   :  { %3835 = vmatprep.subr.msk.mxu0 %vm176_vm1, %v1373_v50 }
 0xd14   :  { %v1371_v33 = vpop.permute.xlu1 %1370 }
 0xd16   :  { %3836 = vmatpush3.xpose.msk.msra.mxu0 %vm176_vm1, %v1373_v50 }
 0xd17   :  { %3837 = vmatprep.subr.msk.mxu0 %vm176_vm1, %v1371_v33 }
 0xd18   :  { %v1538_v2 = vpop.permute.xlu1 %1537 }
 0xd19   :  { %3845 = vmatprep.subr.mxu1 %v1538_v2 }
 0xd1a   :  { %3838 = vmatpush3.xpose.msk.msra.mxu0 %vm176_vm1, %v1371_v33  ;;  %3846 = vmatpush3.msra.mxu1 %v1538_v2 }
 0xd1b   :  { %3847 = vmatprep.subr.mxu1 %v1536_v62 }
 0xd1c   :  { %v1534_v63 = vpop.permute.xlu1 %1533  ;;  %3848 = vmatpush3.msra.mxu1 %v1536_v62 }
 0xd1d   :  { %3840 = vmatmul.mubr.msk.f32.vlgmr.msra.gmra.mxu0 %vm176_vm1, %v4612_v61  ;;  %3849 = vmatprep.subr.mxu1 %v1534_v63 }
 0xd1e   :  { %3842 = vmatprep.mubr.msk.f32.mxu0 %vm176_vm1, %v4608_v41  ;;  %3850 = vmatpush3.msra.mxu1 %v1534_v63 }
 0xd20   :  { %v1532_v8 = vpop.permute.xlu1 %1531 }
 0xd21   :  { %3843 = vmatmul.mubr.msk.f32.gmra.mxu0 %vm176_vm1, %v4606_v59  ;;  %3851 = vmatprep.subr.mxu1 %v1532_v8 }
 0xd22   :  { %3852 = vmatpush3.msra.mxu1 %v1532_v8 }
 0xddd   :  { %v3841_v9 = vpop.f32.mrf.mxu0 }
 0xdde   :  { %v1480_v14 = vmul.f32 0.25, %v3841_v9 }
 0xddf   :  { %v1460_v29 = vpop.f32.mrf.mxu0 }
 0xde0   :  { %v1479_v11 = vmul.f32 0.25, %v1460_v29  ;;  %v1484_v13 = vadd.f32 %v4645_v54, %v1480_v14 }
 0xde1   :  { %v3844_v6 = vpop.f32.mrf.mxu0 }
 0xde2   :  { %v1482_v15 = vmul.f32 0.25, %v3844_v6  ;;  %v1490_v7 = vsel %vm66_vm0, %v1484_v13, -inf  ;;  %v1483_v18 = vadd.f32 %v4652_v17, %v1479_v11 }
 0xde3   :  { %1491 = vmax.xlane.f32.xlu1 %v1490_v7  ;;  %v1470_v19 = vpop.f32.mrf.mxu0 }
 0xde4   :  { %v1481_v20 = vmul.f32 0.25, %v1470_v19  ;;  %v1487_v12 = vsel %vm66_vm0, %v1483_v18, -inf  ;;  %v1486_v0 = vadd.f32 %v4659_v23, %v1482_v15 }
 0xde5   :  { %1488 = vmax.xlane.f32.xlu0 %v1487_v12 }
 0xde6   :  { %v1496_v1 = vsel %vm66_vm0, %v1486_v0, -inf  ;;  %v1485_v4 = vadd.f32 %v4666_v3, %v1481_v20 }
 0xde8   :  { %v1493_v24 = vsel %vm66_vm0, %v1485_v4, -inf }
 0xde9   :  { %1497 = vmax.xlane.f32.xlu0 %v1496_v1 }
 0xded   :  { %1494 = vmax.xlane.f32.xlu0 %v1493_v24 }
 0xdf4   :  { %1652 = vrot.lane.b32.xlu1 %v4608_v41, %s4188_s28 }
 0xe03   :  { %1654 = vrot.lane.b32.xlu0 %v4606_v59, %s4188_s28 }
 0xe6c   :  { %v1492_v25 = vpop.xlane.xlu1 %1491 }
 0xe6d   :  { %v1500_v27 = vsub.f32 %v1484_v13, %v1492_v25 }
 0xe6e   :  { %v1489_v28 = vpop.xlane.xlu0 %1488 }
 0xe6f   :  { %v1505_v30 = vmul.f32 1.442695, %v1500_v27  ;;  %v1499_v31 = vsub.f32 %v1483_v18, %v1489_v28 }
 0xe70   :  { %v1653_v56 = vpop.permute.xlu1 %1652 }
 0xe71   :  { %4118 = vpow2.f32 %v1505_v30  ;;  %v1503_v32 = vmul.f32 1.442695, %v1499_v31 }
 0xe72   :  { %v1498_v34 = vpop.xlane.xlu0 %1497 }
 0xe73   :  { %4120 = vpow2.f32 %v1503_v32  ;;  %v1502_v48 = vsub.f32 %v1486_v0, %v1498_v34 }
 0xe75   :  { %v1509_v52 = vmul.f32 1.442695, %v1502_v48 }
 0xe76   :  { %v1495_v35 = vpop.xlane.xlu0 %1494 }
 0xe77   :  { %v1501_v49 = vsub.f32 %v1485_v4, %v1495_v35  ;;  %4122 = vpow2.f32 %v1509_v52 }
 0xe79   :  { %v1507_v37 = vmul.f32 1.442695, %v1501_v49 }
 0xe7a   :  { %v1655_v40 = vpop.permute.xlu0 %1654 }
 0xe7b   :  { %3859 = vmatprep.subr.msk.mxu1 %vm176_vm1, %v1655_v40  ;;  %4124 = vpow2.f32 %v1507_v37 }
 0xe7e   :  { %v4119_v42 = vpop.eup %4118 }
 0xe7f   :  { %v1514_v43 = vsel %vm66_vm0, %v4119_v42, 0.0 }
 0xe80   :  { %v4121_v44 = vpop.eup %4120  ;;  %1515 = vadd.xlane.f32.xlu0 %v1514_v43 }
 0xe81   :  { %v1511_v45 = vsel %vm66_vm0, %v4121_v44, 0.0 }
 0xe82   :  { %1512 = vadd.xlane.f32.xlu1 %v1511_v45 }
 0xe84   :  { %v4123_v53 = vpop.eup %4122 }
 0xe85   :  { %v1520_v39 = vsel %vm66_vm0, %v4123_v53, 0.0 }
 0xe88   :  { %v4125_v36 = vpop.eup %4124 }
 0xe89   :  { %v1517_v38 = vsel %vm66_vm0, %v4125_v36, 0.0 }
 0xe93   :  { %1648 = vrot.lane.b32.xlu1 %v4602_v57, %s4188_s28 }
 0xe96   :  { %1650 = vrot.lane.b32.xlu0 %v4612_v61, %s4188_s28 }
 0xeb5   :  { %1521 = vadd.xlane.f32.xlu0 %v1520_v39 }
 0xeb7   :  { %1518 = vadd.xlane.f32.xlu1 %v1517_v38 }
 0xec8   :  { %1642 = vrot.lane.b32.xlu1 %v4612_v61, %s4189_s29 }
 0xecb   :  { %1640 = vrot.lane.b32.xlu0 %v4602_v57, %s4189_s29 }
 0xecc   :  { %1646 = vrot.lane.b32.xlu1 %v4606_v59, %s4189_s29 }
 0xecf   :  { %1644 = vrot.lane.b32.xlu0 %v4608_v41, %s4189_s29 }
 0xf09   :  { %v1516_v58 = vpop.xlane.xlu0 %1515 }
 0xf0a   :  { %4126 = vrcp.f32 %v1516_v58 }
 0xf0b   :  { %v1513_v60 = vpop.xlane.xlu1 %1512 }
 0xf0c   :  { %4128 = vrcp.f32 %v1513_v60 }
 0xf0d   :  { %v1651_v2 = vpop.permute.xlu0 %1650 }
 0xf0f   :  { %v1649_v62 = vpop.permute.xlu1 %1648 }
 0xf17   :  { %v4127_v51 = vpop.eup %4126 }
 0xf18   :  { %v1526_v33 = vmul.f32 %v4127_v51, %v4119_v42 }
 0xf19   :  { %v4129_v5 = vpop.eup %4128 }
 0xf1a   :  { %v1524_v50 = vmul.f32 %v4129_v5, %v4121_v44 }
 0xf1c   :  { %3853 = vmatprep.mubr.msk.f32.mxu1 %vm66_vm0, %v1524_v50 }
 0xf1d   :  { %3854 = vmatmul.mubr.msk.f32.vlgmr.msra.gmra.mxu1 %vm66_vm0, %v1526_v33 }
 0xf1e   :  { %3860 = vmatpush3.xpose.msk.msra.mxu1 %vm176_vm1, %v1655_v40 }
 0xf1f   :  { %3861 = vmatprep.subr.msk.mxu1 %vm176_vm1, %v1653_v56 }
 0xf22   :  { %3862 = vmatpush3.xpose.msk.msra.mxu1 %vm176_vm1, %v1653_v56 }
 0xf23   :  { %3863 = vmatprep.subr.msk.mxu1 %vm176_vm1, %v1651_v2 }
 0xf26   :  { %3864 = vmatpush3.xpose.msk.msra.mxu1 %vm176_vm1, %v1651_v2 }
 0xf27   :  { %3865 = vmatprep.subr.msk.mxu1 %vm176_vm1, %v1649_v62 }
 0xf2a   :  { %3866 = vmatpush3.xpose.msk.msra.mxu1 %vm176_vm1, %v1649_v62 }
 0xf3e   :  { %v1522_v63 = vpop.xlane.xlu0 %1521 }
 0xf3f   :  { %4130 = vrcp.f32 %v1522_v63 }
 0xf40   :  { %v1519_v8 = vpop.xlane.xlu1 %1518 }
 0xf41   :  { %4132 = vrcp.f32 %v1519_v8 }
 0xf42   :  { %v1641_v11 = vpop.permute.xlu0 %1640 }
 0xf44   :  { %v1643_v6 = vpop.permute.xlu1 %1642 }
 0xf46   :  { %v1645_v15 = vpop.permute.xlu0 %1644 }
 0xf48   :  { %v1647_v7 = vpop.permute.xlu1 %1646 }
 0xf4c   :  { %v4131_v9 = vpop.eup %4130 }
 0xf4d   :  { %v1530_v13 = vmul.f32 %v4131_v9, %v4123_v53 }
 0xf4e   :  { %v4133_v14 = vpop.eup %4132 }
 0xf4f   :  { %v1528_v29 = vmul.f32 %v4133_v14, %v4125_v36 }
 0xf51   :  { %3856 = vmatprep.mubr.msk.f32.mxu1 %vm66_vm0, %v1528_v29 }
 0xf52   :  { %3857 = vmatmul.mubr.msk.f32.gmra.mxu1 %vm66_vm0, %v1530_v13 }
 0xf53   :  { %3867 = vmatprep.mubr.msk.f32.mxu1 %vm176_vm1, %v1641_v11 }
 0xf56   :  { %3868 = vmatmul.mubr.msk.f32.vlgmr.msra.gmra.mxu1 %vm176_vm1, %v1643_v6 }
 0xf57   :  { %3870 = vmatprep.mubr.msk.f32.mxu1 %vm176_vm1, %v1645_v15 }
 0xf5a   :  { %3871 = vmatmul.mubr.msk.f32.gmra.mxu1 %vm176_vm1, %v1647_v7 }
 0xfdd   :  { %v4706_v18 = vpop.f32.mrf.mxu1 }
 0xfdf   :  { %v4708_v19 = vpop.f32.mrf.mxu1 }
0x1012   :  { %v4710_v20 = vpop.f32.mrf.mxu1 }
0x1014   :  { %v4712_v12 = vpop.f32.mrf.mxu1 }
0x1016   :  { %v3869_v0 = vpop.f32.mrf.mxu1 }
0x1017   :  { %v1758_v1 = vmul.f32 0.25, %v3869_v0 }
0x1018   :  { %v1738_v4 = vpop.f32.mrf.mxu1 }
0x1019   :  { %v1757_v24 = vmul.f32 0.25, %v1738_v4  ;;  %v1762_v25 = vadd.f32 %v4645_v54, %v1758_v1 }
0x101a   :  { %v3872_v27 = vpop.f32.mrf.mxu1 }
0x101b   :  { %v1768_v28 = vsel %vm66_vm0, %v1762_v25, -inf  ;;  %v1761_v30 = vadd.f32 %v4652_v17, %v1757_v24  ;;  %v1760_v32 = vmul.f32 0.25, %v3872_v27 }
0x101c   :  { %1769 = vmax.xlane.f32.xlu1 %v1768_v28  ;;  %v1748_v31 = vpop.f32.mrf.mxu1 }
0x101d   :  { %v1759_v34 = vmul.f32 0.25, %v1748_v31  ;;  %v1765_v35 = vsel %vm66_vm0, %v1761_v30, -inf  ;;  %v1764_v43 = vadd.f32 %v4659_v23, %v1760_v32 }
0x101e   :  { %1766 = vmax.xlane.f32.xlu0 %v1765_v35 }
0x101f   :  { %v1763_v40 = vadd.f32 %v4666_v3, %v1759_v34  ;;  %v1774_v54 = vsel %vm66_vm0, %v1764_v43, -inf }
0x1021   :  { %v1771_v42 = vsel %vm66_vm0, %v1763_v40, -inf }
0x1022   :  { %1772 = vmax.xlane.f32.xlu0 %v1771_v42 }
0x1026   :  { %1775 = vmax.xlane.f32.xlu0 %v1774_v54 }
0x102d   :  { %1815 = vrot.lane.b32.xlu1 %v4606_v59, %s4190_s30 }
0x10a5   :  { %v1770_v17 = vpop.xlane.xlu1 %1769 }
0x10a6   :  { %v1778_v44 = vsub.f32 %v1762_v25, %v1770_v17 }
0x10a7   :  { %v1767_v45 = vpop.xlane.xlu0 %1766 }
0x10a8   :  { %v1783_v48 = vmul.f32 1.442695, %v1778_v44  ;;  %v1777_v49 = vsub.f32 %v1761_v30, %v1767_v45 }
0x10a9   :  { %v1816_v52 = vpop.permute.xlu1 %1815 }
0x10aa   :  { %4134 = vpow2.f32 %v1783_v48  ;;  %v1781_v37 = vmul.f32 1.442695, %v1777_v49  ;;  %3873 = vmatprep.subr.mxu0 %v1816_v52 }
0x10ab   :  { %3874 = vmatpush3.msra.mxu0 %v1816_v52  ;;  %v1773_v3 = vpop.xlane.xlu0 %1772 }
0x10ac   :  { %4136 = vpow2.f32 %v1781_v37  ;;  %v1779_v51 = vsub.f32 %v1763_v40, %v1773_v3 }
0x10ae   :  { %v1785_v5 = vmul.f32 1.442695, %v1779_v51 }
0x10af   :  { %v1776_v23 = vpop.xlane.xlu0 %1775 }
0x10b0   :  { %v1780_v53 = vsub.f32 %v1764_v43, %v1776_v23 }
0x10b2   :  { %v1787_v36 = vmul.f32 1.442695, %v1780_v53 }
0x10b4   :  { %4138 = vpow2.f32 %v1787_v36 }
0x10b5   :  { %4140 = vpow2.f32 %v1785_v5 }
0x10b7   :  { %v4135_v39 = vpop.eup %4134 }
0x10b8   :  { %v1792_v38 = vsel %vm66_vm0, %v4135_v39, 0.0 }
0x10b9   :  { %v4137_v59 = vpop.eup %4136  ;;  %1793 = vadd.xlane.f32.xlu0 %v1792_v38 }
0x10ba   :  { %v1789_v56 = vsel %vm66_vm0, %v4137_v59, 0.0 }
0x10bb   :  { %1790 = vadd.xlane.f32.xlu1 %v1789_v56 }
0x10c1   :  { %v4139_v58 = vpop.eup %4138 }
0x10c2   :  { %v1798_v60 = vsel %vm66_vm0, %v4139_v58, 0.0  ;;  %v4141_v50 = vpop.eup %4140 }
0x10c3   :  { %1799 = vadd.xlane.f32.xlu0 %v1798_v60  ;;  %v1795_v33 = vsel %vm66_vm0, %v4141_v50, 0.0 }
0x10cc   :  { %1811 = vrot.lane.b32.xlu1 %v4612_v61, %s4190_s30 }
0x10d9   :  { %1813 = vrot.lane.b32.xlu0 %v4608_v41, %s4190_s30 }
0x10dd   :  { %1952 = vrot.lane.b32.xlu0 %v4552_v10, %s4191_s8 }
0x10e1   :  { %1948 = vrot.lane.b32.xlu0 %v4564_v21, %s4191_s8 }
0x10e5   :  { %1946 = vrot.lane.b32.xlu0 %v4571_v22, %s4191_s8 }
0x10f0   :  { %1796 = vadd.xlane.f32.xlu1 %v1795_v33 }
0x1101   :  { %1809 = vrot.lane.b32.xlu1 %v4602_v57, %s4190_s30 }
0x1105   :  { %1950 = vrot.lane.b32.xlu1 %v4557_v16, %s4191_s8 }
0x1142   :  { %v1794_v10 = vpop.xlane.xlu0 %1793 }
0x1144   :  { %v1791_v41 = vpop.xlane.xlu1 %1790 }
0x1145   :  { %4142 = vrcp.f32 %v1791_v41 }
0x1146   :  { %4144 = vrcp.f32 %v1794_v10 }
0x1148   :  { %v1812_v62 = vpop.permute.xlu1 %1811 }
0x114c   :  { %v1800_v61 = vpop.xlane.xlu0 %1799 }
0x114d   :  { %4146 = vrcp.f32 %v1800_v61 }
0x1150   :  { %v1814_v2 = vpop.permute.xlu0 %1813 }
0x1151   :  { %3875 = vmatprep.subr.mxu0 %v1814_v2 }
0x1152   :  { %v4143_v21 = vpop.eup %4142  ;;  %3876 = vmatpush3.msra.mxu0 %v1814_v2 }
0x1153   :  { %3877 = vmatprep.subr.mxu0 %v1812_v62  ;;  %v1802_v22 = vmul.f32 %v4143_v21, %v4137_v59  ;;  %v4145_v63 = vpop.eup %4144  ;;  %v3413_v21 = vld [vmem:[%s5066_s5 + $0x78] sm:$0xff] }
0x1154   :  { %3878 = vmatpush3.msra.mxu0 %v1812_v62  ;;  %v1804_v8 = vmul.f32 %v4145_v63, %v4135_v39  ;;  %v1953_v13 = vpop.permute.xlu0 %1952  ;;  %v3412_v62 = vld [vmem:[%s5066_s5 + $0x70] sm:$0xff]  ;;  %3901 = vmatprep.subr.mxu1 %v3413_v21 }
0x1155   :  { %3881 = vmatprep.mubr.msk.f32.mxu0 %vm66_vm0, %v1802_v22  ;;  %3902 = vmatpush3.msra.mxu1 %v3413_v21  ;;  %v3411_v22 = vld [vmem:[%s5066_s5 + $0x68] sm:$0xff] }
0x1156   :  { %3903 = vmatprep.subr.mxu1 %v3412_v62 }
0x1157   :  { %3904 = vmatpush3.msra.mxu1 %v3412_v62 }
0x1158   :  { %v1949_v15 = vpop.permute.xlu0 %1948  ;;  %3905 = vmatprep.subr.mxu1 %v3411_v22 }
0x1159   :  { %3906 = vmatpush3.msra.mxu1 %v3411_v22 }
0x115a   :  { %v4147_v9 = vpop.eup %4146 }
0x115b   :  { %v1808_v11 = vmul.f32 %v4147_v9, %v4139_v58 }
0x115c   :  { %v1947_v7 = vpop.permute.xlu0 %1946 }
0x1179   :  { %v1797_v57 = vpop.xlane.xlu1 %1796 }
0x117a   :  { %4148 = vrcp.f32 %v1797_v57  ;;  %v3410_v57 = vld [vmem:[%s5066_s5 + $0x60] sm:$0xff] }
0x117b   :  { %3907 = vmatprep.subr.mxu1 %v3410_v57 }
0x117c   :  { %3908 = vmatpush3.msra.mxu1 %v3410_v57 }
0x117d   :  { %v1810_v16 = vpop.permute.xlu1 %1809 }
0x117e   :  { %3879 = vmatprep.subr.mxu0 %v1810_v16 }
0x117f   :  { %3880 = vmatpush3.msra.mxu0 %v1810_v16 }
0x1180   :  { %3882 = vmatmul.mubr.msk.f32.vlgmr.msra.gmra.mxu0 %vm66_vm0, %v1804_v8  ;;  %3887 = vmatprep.subr.mxu0 %v1953_v13 }
0x1181   :  { %v1951_v6 = vpop.permute.xlu1 %1950  ;;  %3888 = vmatpush3.msra.mxu0 %v1953_v13 }
0x1182   :  { %3889 = vmatprep.subr.mxu0 %v1951_v6 }
0x1183   :  { %3890 = vmatpush3.msra.mxu0 %v1951_v6 }
0x1184   :  { %3891 = vmatprep.subr.mxu0 %v1949_v15 }
0x1185   :  { %3892 = vmatpush3.msra.mxu0 %v1949_v15 }
0x1186   :  { %3893 = vmatprep.subr.mxu0 %v1947_v7 }
0x1187   :  { %v4149_v14 = vpop.eup %4148  ;;  %3894 = vmatpush3.msra.mxu0 %v1947_v7 }
0x1188   :  { %v1806_v29 = vmul.f32 %v4149_v14, %v4141_v50 }
0x118a   :  { %3884 = vmatprep.mubr.msk.f32.mxu0 %vm66_vm0, %v1806_v29 }
0x118b   :  { %3885 = vmatmul.mubr.msk.f32.gmra.mxu0 %vm66_vm0, %v1808_v11 }
0x1240   :  { %v3883_v0 = vpop.f32.mrf.mxu0 }
0x1242   :  { %v1899_v1 = vpop.f32.mrf.mxu0 }
0x1243   :  { %1922 = vrot.lane.b32.xlu1 %v1899_v1, %s4192_s9 }
0x1247   :  { %1924 = vrot.lane.b32.xlu1 %v3883_v0, %s4192_s9 }
0x124b   :  { %v3886_v4 = vpop.f32.mrf.mxu0 }
0x124c   :  { %1928 = vrot.lane.b32.xlu1 %v3886_v4, %s4192_s9 }
0x124d   :  { %v1909_v24 = vpop.f32.mrf.mxu0 }
0x124e   :  { %1926 = vrot.lane.b32.xlu0 %v1909_v24, %s4192_s9  ;;  %v3456_v24 = vld [vmem:[%s5064_s4 + $0xa] ss:$0 sm:$0xff] }
0x12b5   :  { %v1923_v25 = vpop.permute.xlu1 %1922 }
0x12b6   :  { %v1934_v27 = vsel %vm176_vm1, %v4708_v19, %v1923_v25  ;;  %v3451_v19 = vld [vmem:[%s5064_s4 + $0x9] ss:$0 sm:$0xff] }
0x12b7   :  { %3895 = vmatprep.mubr.msk.f32.mxu0 %vm66_vm0, %v1934_v27 }
0x12b9   :  { %v1925_v28 = vpop.permute.xlu1 %1924 }
0x12ba   :  { %v1935_v30 = vsel %vm176_vm1, %v4706_v18, %v1925_v28 }
0x12bb   :  { %3896 = vmatmul.mubr.msk.f32.vlgmr.msra.gmra.mxu0 %vm66_vm0, %v1935_v30  ;;  %v3457_v30 = vld [vmem:[%s5064_s4 + $0xb] ss:$0 sm:$0xff] }
0x12be   :  { %v1929_v31 = vpop.permute.xlu1 %1928 }
0x12bf   :  { %v1937_v35 = vsel %vm176_vm1, %v4710_v20, %v1929_v31 }
0x12c0   :  { %v1927_v32 = vpop.permute.xlu0 %1926 }
0x12c1   :  { %v1936_v34 = vsel %vm176_vm1, %v4712_v12, %v1927_v32 }
0x12c2   :  { %3898 = vmatprep.mubr.msk.f32.mxu0 %vm66_vm0, %v1936_v34 }
0x12c3   :  { %3899 = vmatmul.mubr.msk.f32.gmra.mxu0 %vm66_vm0, %v1937_v35 }
0x137b   :  { %v3897_v40 = vpop.f32.mrf.mxu0 }
0x137c   :  { %v2042_v18 = vadd.f32 %v3897_v40, %v3451_v19 }
0x137d   :  { %v2036_v42 = vpop.f32.mrf.mxu0 }
0x137e   :  { %v2056_v43 = vadd.f32 %v2042_v18, %v4585_v47  ;;  %v2037_v54 = vadd.f32 %v3451_v19, %v2036_v42 }
0x1380   :  { %v2055_v17 = vadd.f32 %v2037_v54, %v4583_v46  ;;  %v2062_v12 = vsel %vm66_vm0, %v2056_v43, 0.0 }
0x1381   :  { %2063 = vadd.xlane.f32.xlu1 %v2062_v12  ;;  %v3421_v12 = vld [vmem:[%s5066_s5 + $0xb8] sm:$0xff] }
0x1382   :  { %v2059_v20 = vsel %vm66_vm0, %v2055_v17, 0.0  ;;  %3915 = vmatprep.subr.mxu0 %v3421_v12 }
0x1383   :  { %2060 = vadd.xlane.f32.xlu0 %v2059_v20  ;;  %v3900_v44 = vpop.f32.mrf.mxu0  ;;  %3916 = vmatpush3.msra.mxu0 %v3421_v12  ;;  %v3420_v20 = vld [vmem:[%s5066_s5 + $0xb0] sm:$0xff] }
0x1384   :  { %v2052_v48 = vadd.f32 %v3900_v44, %v3451_v19  ;;  %3917 = vmatprep.subr.mxu0 %v3420_v20  ;;  %v3419_v44 = vld [vmem:[%s5066_s5 + $0xa8] sm:$0xff] }
0x1385   :  { %v2046_v45 = vpop.f32.mrf.mxu0  ;;  %3918 = vmatpush3.msra.mxu0 %v3420_v20 }
0x1386   :  { %v2047_v49 = vadd.f32 %v3451_v19, %v2046_v45  ;;  %v2058_v37 = vadd.f32 %v2052_v48, %v4593_v26  ;;  %3919 = vmatprep.subr.mxu0 %v3419_v44  ;;  %v3418_v45 = vld [vmem:[%s5066_s5 + $0xa0] sm:$0xff]  ;;  %v3417_v48 = vld [vmem:[%s5066_s5 + $0x98] sm:$0xff] }
0x1387   :  { %3920 = vmatpush3.msra.mxu0 %v3419_v44 }
0x1388   :  { %v2057_v52 = vadd.f32 %v2047_v49, %v4591_v55  ;;  %v2068_v47 = vsel %vm66_vm0, %v2058_v37, 0.0  ;;  %3921 = vmatprep.subr.mxu0 %v3418_v45  ;;  %v3416_v49 = vld [vmem:[%s5066_s5 + $0x90] sm:$0xff] }
0x1389   :  { %3922 = vmatpush3.msra.mxu0 %v3418_v45 }
0x138a   :  { %v2065_v3 = vsel %vm66_vm0, %v2057_v52, 0.0  ;;  %3923 = vmatprep.subr.mxu0 %v3417_v48 }
0x138b   :  { %2066 = vadd.xlane.f32.xlu0 %v2065_v3  ;;  %3924 = vmatpush3.msra.mxu0 %v3417_v48  ;;  %v3458_v3 = vld [vmem:[%s5064_s4 + $0xc] ss:$0 sm:$0xff] }
0x138c   :  { %3925 = vmatprep.subr.mxu0 %v3416_v49 }
0x138d   :  { %3926 = vmatpush3.msra.mxu0 %v3416_v49 }
0x138f   :  { %2069 = vadd.xlane.f32.xlu0 %v2068_v47 }
0x140a   :  { %v2064_v46 = vpop.xlane.xlu1 %2063 }
0x140b   :  { %v2072_v23 = vmul.f32 0.03125, %v2064_v46 }
0x140c   :  { %v2061_v53 = vpop.xlane.xlu0 %2060 }
0x140d   :  { %v2076_v36 = vsub.f32 %v2056_v43, %v2072_v23  ;;  %v2071_v39 = vmul.f32 0.03125, %v2061_v53 }
0x140f   :  { %v2075_v38 = vsub.f32 %v2055_v17, %v2071_v39  ;;  %v2080_v59 = vmul.f32 %v2076_v36, %v2076_v36 }
0x1411   :  { %v2086_v56 = vsel %vm66_vm0, %v2080_v59, 0.0  ;;  %v2079_v58 = vmul.f32 %v2075_v38, %v2075_v38 }
0x1412   :  { %2087 = vadd.xlane.f32.xlu0 %v2086_v56 }
0x1413   :  { %v2083_v55 = vsel %vm66_vm0, %v2079_v58, 0.0 }
0x1414   :  { %2084 = vadd.xlane.f32.xlu1 %v2083_v55  ;;  %v2067_v26 = vpop.xlane.xlu0 %2066 }
0x1415   :  { %v2073_v60 = vmul.f32 0.03125, %v2067_v26 }
0x1417   :  { %v2077_v51 = vsub.f32 %v2057_v52, %v2073_v60  ;;  %v3415_v52 = vld [vmem:[%s5066_s5 + $0x88] sm:$0xff] }
0x1418   :  { %v2070_v5 = vpop.xlane.xlu0 %2069  ;;  %3927 = vmatprep.subr.mxu0 %v3415_v52 }
0x1419   :  { %v2074_v50 = vmul.f32 0.03125, %v2070_v5  ;;  %v2081_v33 = vmul.f32 %v2077_v51, %v2077_v51  ;;  %3928 = vmatpush3.msra.mxu0 %v3415_v52 }
0x141b   :  { %v2078_v41 = vsub.f32 %v2058_v37, %v2074_v50  ;;  %v2089_v10 = vsel %vm66_vm0, %v2081_v33, 0.0  ;;  %v3414_v37 = vld [vmem:[%s5066_s5 + $0x80] sm:$0xff] }
0x141c   :  { %2090 = vadd.xlane.f32.xlu1 %v2089_v10  ;;  %3929 = vmatprep.subr.mxu0 %v3414_v37 }
0x141d   :  { %v2082_v61 = vmul.f32 %v2078_v41, %v2078_v41  ;;  %3930 = vmatpush3.msra.mxu0 %v3414_v37 }
0x141f   :  { %v2092_v2 = vsel %vm66_vm0, %v2082_v61, 0.0 }
0x1420   :  { %2093 = vadd.xlane.f32.xlu0 %v2092_v2 }
0x149b   :  { %v2088_v63 = vpop.xlane.xlu0 %2087 }
0x149c   :  { %v2096_v16 = vmul.f32 0.03125, %v2088_v63 }
0x149d   :  { %v2085_v8 = vpop.xlane.xlu1 %2084 }
0x149e   :  { %v2100_v9 = vadd.f32 1e-06, %v2096_v16  ;;  %v2095_v14 = vmul.f32 0.03125, %v2085_v8 }
0x14a0   :  { %4150 = vrsqrt.f32 %v2100_v9  ;;  %v2099_v29 = vadd.f32 1e-06, %v2095_v14 }
0x14a2   :  { %4152 = vrsqrt.f32 %v2099_v29 }
0x14a5   :  { %v2091_v11 = vpop.xlane.xlu1 %2090 }
0x14a6   :  { %v2097_v13 = vmul.f32 0.03125, %v2091_v11 }
0x14a8   :  { %v2101_v6 = vadd.f32 1e-06, %v2097_v13 }
0x14a9   :  { %v2094_v15 = vpop.xlane.xlu0 %2093 }
0x14aa   :  { %4154 = vrsqrt.f32 %v2101_v6  ;;  %v2098_v7 = vmul.f32 0.03125, %v2094_v15 }
0x14ac   :  { %v2102_v0 = vadd.f32 1e-06, %v2098_v7 }
0x14ad   :  { %v4151_v1 = vpop.eup %4150 }
0x14ae   :  { %v2108_v4 = vmul.f32 %v4151_v1, %v2076_v36  ;;  %4156 = vrsqrt.f32 %v2102_v0 }
0x14af   :  { %v4153_v25 = vpop.eup %4152 }
0x14b0   :  { %v2107_v27 = vmul.f32 %v4153_v25, %v2075_v38  ;;  %v2116_v28 = vmul.f32 %v3456_v24, %v2108_v4 }
0x14b2   :  { %v2115_v31 = vmul.f32 %v3456_v24, %v2107_v27  ;;  %v4797_v34 = vadd.f32 %v3457_v30, %v2116_v28 }
0x14b4   :  { %v4795_v32 = vadd.f32 %v3457_v30, %v2115_v31 }
0x14b6   :  { %3909 = vmatprep.mubr.msk.f32.mxu1 %vm66_vm0, %v4795_v32 }
0x14b7   :  { %v4155_v35 = vpop.eup %4154  ;;  %3910 = vmatmul.mubr.msk.f32.vlgmr.msra.gmra.mxu1 %vm66_vm0, %v4797_v34 }
0x14b8   :  { %v2109_v19 = vmul.f32 %v4155_v35, %v2077_v51  ;;  %v3463_v35 = vld [vmem:[%s5064_s4 + $0xd] ss:$0 sm:$0xff] }
0x14ba   :  { %v2117_v40 = vmul.f32 %v3456_v24, %v2109_v19 }
0x14bb   :  { %v4157_v18 = vpop.eup %4156 }
0x14bc   :  { %v4803_v42 = vadd.f32 %v3457_v30, %v2117_v40  ;;  %v2110_v43 = vmul.f32 %v4157_v18, %v2078_v41 }
0x14be   :  { %3912 = vmatprep.mubr.msk.f32.mxu1 %vm66_vm0, %v4803_v42  ;;  %v2118_v54 = vmul.f32 %v3456_v24, %v2110_v43 }
0x14c0   :  { %v4807_v17 = vadd.f32 %v3457_v30, %v2118_v54 }
0x14c2   :  { %3913 = vmatmul.mubr.msk.f32.gmra.mxu1 %vm66_vm0, %v4807_v17 }
0x1577   :  { %v3911_v47 = vpop.f32.mrf.mxu1 }
0x1578   :  { %v2215_v46 = vadd.f32 %v3911_v47, %v3458_v3 }
0x1579   :  { %v2209_v23 = vpop.f32.mrf.mxu1 }
0x157a   :  { %v2233_v53 = vmul.f32 0.044715, %v2215_v46  ;;  %v2210_v36 = vadd.f32 %v3458_v3, %v2209_v23  ;;  %v2229_v6 = vmul.f32 0.5, %v2215_v46 }
0x157c   :  { %v2237_v39 = vmul.f32 %v2233_v53, %v2215_v46  ;;  %v2232_v38 = vmul.f32 0.044715, %v2210_v36  ;;  %v2228_v11 = vmul.f32 0.5, %v2210_v36 }
0x157e   :  { %v2241_v59 = vmul.f32 %v2237_v39, %v2215_v46  ;;  %v2236_v56 = vmul.f32 %v2232_v38, %v2210_v36 }
0x1580   :  { %v2245_v58 = vadd.f32 %v2241_v59, %v2215_v46  ;;  %v2240_v55 = vmul.f32 %v2236_v56, %v2210_v36 }
0x1582   :  { %v2249_v26 = vmul.f32 0.7978846, %v2245_v58  ;;  %v2244_v60 = vadd.f32 %v2240_v55, %v2210_v36  ;;  %v3914_v51 = vpop.f32.mrf.mxu1 }
0x1583   :  { %v2225_v5 = vadd.f32 %v3914_v51, %v3458_v3 }
0x1584   :  { %4158 = vtanh.f32 %v2249_v26  ;;  %v2219_v50 = vpop.f32.mrf.mxu1  ;;  %v2248_v33 = vmul.f32 0.7978846, %v2244_v60 }
0x1585   :  { %v2235_v41 = vmul.f32 0.044715, %v2225_v5  ;;  %v2220_v10 = vadd.f32 %v3458_v3, %v2219_v50  ;;  %v2231_v27 = vmul.f32 0.5, %v2225_v5 }
0x1586   :  { %4160 = vtanh.f32 %v2248_v33 }
0x1587   :  { %v2239_v61 = vmul.f32 %v2235_v41, %v2225_v5  ;;  %v2234_v2 = vmul.f32 0.044715, %v2220_v10  ;;  %v2230_v24 = vmul.f32 0.5, %v2220_v10 }
0x1589   :  { %v2243_v21 = vmul.f32 %v2239_v61, %v2225_v5  ;;  %v2238_v62 = vmul.f32 %v2234_v2, %v2220_v10 }
0x158b   :  { %v2247_v22 = vadd.f32 %v2243_v21, %v2225_v5  ;;  %v2242_v57 = vmul.f32 %v2238_v62, %v2220_v10  ;;  %v4193_v21 = vmov 0.0  }
0x158c   :  { %3937 = vmatprep.subr.mxu1 %v4193_v21  ;;  %3945 = vmatprep.mubr.msk.f32.mxu1 %vm4194_vm3, %v4193_v21 }
0x158d   :  { %v2246_v63 = vadd.f32 %v2242_v57, %v2220_v10  ;;  %v2251_v16 = vmul.f32 0.7978846, %v2247_v22 }
0x158f   :  { %v2250_v8 = vmul.f32 0.7978846, %v2246_v63  ;;  %4162 = vtanh.f32 %v2251_v16 }
0x1591   :  { %v4159_v9 = vpop.eup %4158  ;;  %4164 = vtanh.f32 %v2250_v8 }
0x1592   :  { %v2257_v29 = vadd.f32 1.0, %v4159_v9 }
0x1593   :  { %v4161_v14 = vpop.eup %4160 }
0x1594   :  { %v2256_v13 = vadd.f32 1.0, %v4161_v14  ;;  %v2261_v7 = vmul.f32 %v2257_v29, %v2229_v6 }
0x1596   :  { %v2260_v15 = vmul.f32 %v2256_v13, %v2228_v11 }
0x1598   :  { %3931 = vmatprep.mubr.msk.f32.mxu0 %vm1068_vm2, %v2260_v15 }
0x1599   :  { %3932 = vmatmul.mubr.msk.f32.vlgmr.msra.gmra.mxu0 %vm1068_vm2, %v2261_v7  ;;  %v3468_v7 = vld [vmem:[%s5064_s4 + $0xe] ss:$0 sm:$0xff] }
0x159c   :  { %v4163_v0 = vpop.eup %4162 }
0x159d   :  { %v2259_v4 = vadd.f32 1.0, %v4163_v0 }
0x159e   :  { %v4165_v1 = vpop.eup %4164 }
0x159f   :  { %v2258_v25 = vadd.f32 1.0, %v4165_v1  ;;  %v2263_v30 = vmul.f32 %v2259_v4, %v2231_v27  ;;  %v3469_v4 = vld [vmem:[%s5064_s4 + $0xf] ss:$0 sm:$0xff] }
0x15a1   :  { %v2262_v28 = vmul.f32 %v2258_v25, %v2230_v24 }
0x15a3   :  { %3934 = vmatprep.mubr.msk.f32.mxu0 %vm1068_vm2, %v2262_v28 }
0x15a4   :  { %3935 = vmatmul.mubr.msk.f32.gmra.mxu0 %vm1068_vm2, %v2263_v30 }
0x1659   :  { %v3933_v31 = vpop.f32.mrf.mxu0 }
0x165a   :  { %v2352_v18 = vadd.f32 %v3933_v31, %v3463_v35 }
0x165b   :  { %v2346_v19 = vpop.f32.mrf.mxu0 }
0x165c   :  { %v2347_v12 = vadd.f32 %v3463_v35, %v2346_v19  ;;  %v2366_v45 = vadd.f32 %v2352_v18, %v4797_v34  ;;  %v4856_v34 = vld [vmem:[%s5067_s6 + $0x30] sm:$0xff] }
0x165d   :  { %3959 = vmatprep.subr.mxu0 %v4856_v34 }
0x165e   :  { %v2365_v52 = vadd.f32 %v2347_v12, %v4795_v32  ;;  %v2372_v3 = vsel %vm66_vm0, %v2366_v45, 0.0  ;;  %3960 = vmatpush3.msra.mxu0 %v4856_v34  ;;  %v4863_v32 = vld [vmem:[%s5067_s6 + $0x20] sm:$0xff] }
0x165f   :  { %3961 = vmatprep.subr.mxu0 %v4863_v32 }
0x1660   :  { %v2369_v47 = vsel %vm66_vm0, %v2365_v52, 0.0  ;;  %3962 = vmatpush3.msra.mxu0 %v4863_v32 }
0x1664   :  { %v3936_v40 = vpop.f32.mrf.mxu0 }
0x1665   :  { %v2362_v43 = vadd.f32 %v3936_v40, %v3463_v35 }
0x1666   :  { %v2356_v54 = vpop.f32.mrf.mxu0 }
0x1667   :  { %v2368_v20 = vadd.f32 %v2362_v43, %v4807_v17  ;;  %v2357_v44 = vadd.f32 %v3463_v35, %v2356_v54  ;;  %v4876_v17 = vld [vmem:[%s5067_s6] sm:$0xff] }
0x1669   :  { %v2367_v48 = vadd.f32 %v2357_v44, %v4803_v42  ;;  %v2378_v49 = vsel %vm66_vm0, %v2368_v20, 0.0  ;;  %v4869_v42 = vld [vmem:[%s5067_s6 + $0x10] sm:$0xff]  ;;  %v2437_v44 = vld [vmem:[%s5068_s2] sm:$0xff] }
0x166a   :  { %2379 = vadd.xlane.f32.xlu1 %v2378_v49  ;;  %3963 = vmatprep.subr.mxu0 %v4869_v42 }
0x166b   :  { %v2375_v37 = vsel %vm66_vm0, %v2367_v48, 0.0  ;;  %3964 = vmatpush3.msra.mxu0 %v4869_v42 }
0x166c   :  { %2376 = vadd.xlane.f32.xlu0 %v2375_v37  ;;  %3965 = vmatprep.subr.mxu0 %v4876_v17 }
0x166d   :  { %3966 = vmatpush3.msra.mxu0 %v4876_v17 }
0x166e   :  { %2373 = vadd.xlane.f32.xlu1 %v2372_v3 }
0x1670   :  { %2370 = vadd.xlane.f32.xlu0 %v2369_v47 }
0x16f3   :  { %v2380_v46 = vpop.xlane.xlu1 %2379 }
0x16f4   :  { %v2384_v23 = vmul.f32 0.03125, %v2380_v46 }
0x16f5   :  { %v2377_v53 = vpop.xlane.xlu0 %2376 }
0x16f6   :  { %v2388_v36 = vsub.f32 %v2368_v20, %v2384_v23  ;;  %v2383_v39 = vmul.f32 0.03125, %v2377_v53  ;;  %v2439_v20 = vld [vmem:[%s5068_s2 + $0x10] sm:$0x3]  ;;  %v2440_v53 = vld [vmem:[%s5068_s2 + $0x12] sm:$0xff] }
0x16f7   :  { %v2374_v38 = vpop.xlane.xlu1 %2373 }
0x16f8   :  { %v2387_v59 = vsub.f32 %v2367_v48, %v2383_v39  ;;  %v2382_v56 = vmul.f32 0.03125, %v2374_v38  ;;  %v2392_v58 = vmul.f32 %v2388_v36, %v2388_v36  ;;  %v2438_v48 = vld [vmem:[%s5068_s2 + $0x8] sm:$0xff] }
0x16f9   :  { %v2371_v55 = vpop.xlane.xlu0 %2370 }
0x16fa   :  { %v2386_v26 = vsub.f32 %v2366_v45, %v2382_v56  ;;  %v2381_v60 = vmul.f32 0.03125, %v2371_v55  ;;  %v2402_v51 = vsel %vm66_vm0, %v2392_v58, 0.0  ;;  %v2391_v5 = vmul.f32 %v2387_v59, %v2387_v59 }
0x16fb   :  { %2403 = vadd.xlane.f32.xlu1 %v2402_v51 }
0x16fc   :  { %v2385_v50 = vsub.f32 %v2365_v52, %v2381_v60  ;;  %v2399_v33 = vsel %vm66_vm0, %v2391_v5, 0.0  ;;  %v2390_v41 = vmul.f32 %v2386_v26, %v2386_v26 }
0x16fd   :  { %2400 = vadd.xlane.f32.xlu0 %v2399_v33 }
0x16fe   :  { %v2396_v10 = vsel %vm66_vm0, %v2390_v41, 0.0  ;;  %v2389_v61 = vmul.f32 %v2385_v50, %v2385_v50 }
0x16ff   :  { %2397 = vadd.xlane.f32.xlu1 %v2396_v10 }
0x1700   :  { %v2393_v2 = vsel %vm66_vm0, %v2389_v61, 0.0 }
0x1701   :  { %2394 = vadd.xlane.f32.xlu0 %v2393_v2 }
0x1710   :  { %2697 = vrot.lane.b32.xlu1 %v4856_v34, %s4186_s19 }
0x1714   :  { %2693 = vrot.lane.b32.xlu1 %v4869_v42, %s4186_s19 }
0x1717   :  { %2695 = vrot.lane.b32.xlu0 %v4863_v32, %s4186_s19 }
0x1718   :  { %2691 = vrot.lane.b32.xlu1 %v4876_v17, %s4186_s19 }
0x171b   :  { %2806 = vrot.lane.b32.xlu0 %v4856_v34, %s4187_s0 }
0x171c   :  { %2804 = vrot.lane.b32.xlu1 %v4863_v32, %s4187_s0 }
0x171f   :  { %2802 = vrot.lane.b32.xlu0 %v4869_v42, %s4187_s0 }
0x1720   :  { %2800 = vrot.lane.b32.xlu1 %v4876_v17, %s4187_s0 }
0x1784   :  { %v2404_v62 = vpop.xlane.xlu1 %2403 }
0x1785   :  { %v2408_v22 = vmul.f32 0.03125, %v2404_v62  ;;  %v35_v62 = vld [vmem:[%s5065_s1 + $0x28] sm:$0xff] }
0x1786   :  { %v2401_v57 = vpop.xlane.xlu0 %2400 }
0x1787   :  { %v2412_v63 = vadd.f32 1e-06, %v2408_v22  ;;  %v2407_v16 = vmul.f32 0.03125, %v2401_v57 }
0x1788   :  { %v2398_v8 = vpop.xlane.xlu1 %2397 }
0x1789   :  { %4166 = vrsqrt.f32 %v2412_v63  ;;  %v2411_v9 = vadd.f32 1e-06, %v2407_v16  ;;  %v2406_v14 = vmul.f32 0.03125, %v2398_v8  ;;  %v34_v63 = vld [vmem:[%s5065_s1 + $0x20] sm:$0xff] }
0x178a   :  { %v2395_v29 = vpop.xlane.xlu0 %2394 }
0x178b   :  { %4168 = vrsqrt.f32 %v2411_v9  ;;  %v2410_v11 = vadd.f32 1e-06, %v2406_v14  ;;  %v2405_v13 = vmul.f32 0.03125, %v2395_v29 }
0x178c   :  { %v2698_v45 = vpop.permute.xlu1 %2697 }
0x178d   :  { %4170 = vrsqrt.f32 %v2410_v11  ;;  %v2409_v6 = vadd.f32 1e-06, %v2405_v13 }
0x178e   :  { %v2696_v52 = vpop.permute.xlu0 %2695 }
0x178f   :  { %4172 = vrsqrt.f32 %v2409_v6 }
0x1790   :  { %v2694_v49 = vpop.permute.xlu1 %2693 }
0x1792   :  { %v2807_v3 = vpop.permute.xlu0 %2806 }
0x1793   :  { %3984 = vmatprep.subr.mxu0 %v2807_v3 }
0x1794   :  { %v2692_v37 = vpop.permute.xlu1 %2691 }
0x1796   :  { %v4167_v15 = vpop.eup %4166  ;;  %v2803_v58 = vpop.permute.xlu0 %2802 }
0x1797   :  { %v2420_v0 = vmul.f32 %v4167_v15, %v2388_v36  ;;  %v2441_v36 = vld [vmem:[%s5068_s2 + $0x1a] sm:$0xff] }
0x1798   :  { %v4169_v1 = vpop.eup %4168 }
0x1799   :  { %v2428_v24 = vmul.f32 %v3468_v7, %v2420_v0  ;;  %v2419_v25 = vmul.f32 %v4169_v1, %v2387_v59  ;;  %v2805_v59 = vpop.permute.xlu1 %2804 }
0x179a   :  { %v4171_v27 = vpop.eup %4170 }
0x179b   :  { %v2427_v28 = vmul.f32 %v3468_v7, %v2419_v25  ;;  %v2418_v30 = vmul.f32 %v4171_v27, %v2386_v26  ;;  %v4910_v31 = vadd.f32 %v3469_v4, %v2428_v24 }
0x179c   :  { %v4173_v35 = vpop.eup %4172 }
0x179d   :  { %v2426_v19 = vmul.f32 %v3468_v7, %v2418_v30  ;;  %v2417_v40 = vmul.f32 %v4173_v35, %v2385_v50  ;;  %3938 = vmatpush3.msra.mxu1 %v4910_v31  ;;  %v4913_v18 = vadd.f32 %v3469_v4, %v2427_v28  ;;  %v2801_v26 = vpop.permute.xlu1 %2800 }
0x179e   :  { %3939 = vmatprep.subr.mxu1 %v4193_v21 }
0x179f   :  { %v2425_v43 = vmul.f32 %v3468_v7, %v2417_v40  ;;  %3940 = vmatpush3.msra.mxu1 %v4913_v18  ;;  %v4917_v54 = vadd.f32 %v3469_v4, %v2426_v19 }
0x17a0   :  { %3941 = vmatprep.subr.mxu1 %v4193_v21 }
0x17a1   :  { %3942 = vmatpush3.msra.mxu1 %v4917_v54  ;;  %v4921_v12 = vadd.f32 %v3469_v4, %v2425_v43 }
0x17a2   :  { %3943 = vmatprep.subr.mxu1 %v4193_v21 }
0x17a3   :  { %3944 = vmatpush3.msra.mxu1 %v4921_v12 }
0x17a4   :  { %3946 = vmatmul.mubr.msk.f32.vlgmr.msra.gmra.mxu1 %vm66_vm0, %v2439_v20  ;;  %3948 = vmatprep.subr.mxu1 %v4910_v31  ;;  %v2449_v20 = vld [vmem:[%s5067_s6 + $0x38] sm:$0xff] }
0x17a5   :  { %3949 = vmatpush3.msra.mxu1 %v4910_v31  ;;  %3956 = vmatprep.mubr.msk.f32.mxu1 %vm66_vm0, %v2437_v44  ;;  %v2448_v44 = vld [vmem:[%s5067_s6 + $0x28] sm:$0xff] }
0x17a6   :  { %3950 = vmatprep.subr.mxu1 %v4913_v18 }
0x17a7   :  { %3951 = vmatpush3.msra.mxu1 %v4913_v18 }
0x17a8   :  { %3952 = vmatprep.subr.mxu1 %v4917_v54 }
0x17a9   :  { %3953 = vmatpush3.msra.mxu1 %v4917_v54 }
0x17aa   :  { %3954 = vmatprep.subr.mxu1 %v4921_v12 }
0x17ab   :  { %3955 = vmatpush3.msra.mxu1 %v4921_v12 }
0x17ac   :  { %3957 = vmatmul.mubr.msk.f32.vlgmr.msra.gmra.mxu1 %vm66_vm0, %v2438_v48  ;;  %3970 = vmatprep.subr.mxu1 %v2698_v45  ;;  %v2446_v48 = vld [vmem:[%s5067_s6 + $0x8] sm:$0xff] }
0x17ad   :  { %3971 = vmatpush3.msra.mxu1 %v2698_v45  ;;  %3978 = vmatprep.mubr.msk.f32.mxu1 %vm66_vm0, %v4921_v12  ;;  %v2447_v45 = vld [vmem:[%s5067_s6 + $0x18] sm:$0xff] }
0x17ae   :  { %3972 = vmatprep.subr.mxu1 %v2696_v52 }
0x17af   :  { %3973 = vmatpush3.msra.mxu1 %v2696_v52 }
0x17b0   :  { %3974 = vmatprep.subr.mxu1 %v2694_v49 }
0x17b1   :  { %3975 = vmatpush3.msra.mxu1 %v2694_v49 }
0x17b2   :  { %3976 = vmatprep.subr.mxu1 %v2692_v37 }
0x17b3   :  { %3977 = vmatpush3.msra.mxu1 %v2692_v37 }
0x17b4   :  { %3979 = vmatmul.mubr.msk.f32.vlgmr.msra.gmra.mxu1 %vm66_vm0, %v4917_v54 }
0x17b5   :  { %3981 = vmatprep.mubr.msk.f32.mxu1 %vm66_vm0, %v4913_v18 }
0x17b8   :  { %3982 = vmatmul.mubr.msk.f32.gmra.mxu1 %vm66_vm0, %v4910_v31 }
0x1864   :  { %v4953_v47 = vpop.f32.mrf.mxu1 }
0x1866   :  { %v3947_v46 = vpop.f32.mrf.mxu1 }
0x186c   :  { %v3958_v23 = vpop.f32.mrf.mxu1 }
0x186d   :  { %v4963_v56 = vadd.f32 %v3958_v23, %v2441_v36 }
0x186e   :  { %v2595_v39 = vpop.f32.mrf.mxu1 }
0x186f   :  { %v4961_v38 = vadd.f32 %v2595_v39, %v2440_v53 }
0x1871   :  { %3967 = vmatprep.mubr.msk.f32.mxu0 %vm66_vm0, %v4961_v38 }
0x1872   :  { %3968 = vmatmul.mubr.msk.f32.vlgmr.msra.gmra.mxu0 %vm66_vm0, %v4963_v56 }
0x1873   :  { %3985 = vmatpush3.msra.mxu0 %v2807_v3  ;;  %3992 = vmatprep.mubr.msk.f32.mxu0 %vm66_vm0, %v4921_v12 }
0x1874   :  { %3986 = vmatprep.subr.mxu0 %v2805_v59  ;;  %v3980_v55 = vpop.f32.mrf.mxu1 }
0x1875   :  { %3987 = vmatpush3.msra.mxu0 %v2805_v59 }
0x1876   :  { %3988 = vmatprep.subr.mxu0 %v2803_v58  ;;  %v2781_v60 = vpop.f32.mrf.mxu1 }
0x1877   :  { %3989 = vmatpush3.msra.mxu0 %v2803_v58 }
0x1878   :  { %3990 = vmatprep.subr.mxu0 %v2801_v26  ;;  %v3983_v51 = vpop.f32.mrf.mxu1 }
0x1879   :  { %3991 = vmatpush3.msra.mxu0 %v2801_v26  ;;  %3998 = vmatprep.subr.msk.mxu1 %vm66_vm0, %v3983_v51 }
0x187a   :  { %3993 = vmatmul.mubr.msk.f32.vlgmr.msra.gmra.mxu0 %vm66_vm0, %v4917_v54  ;;  %v2791_v5 = vpop.f32.mrf.mxu1  ;;  %3999 = vmatpush3.xpose.msk.msra.mxu1 %vm66_vm0, %v3983_v51 }
0x187b   :  { %3995 = vmatprep.mubr.msk.f32.mxu0 %vm66_vm0, %v4913_v18  ;;  %4000 = vmatprep.subr.msk.mxu1 %vm66_vm0, %v2791_v5 }
0x187e   :  { %3996 = vmatmul.mubr.msk.f32.gmra.mxu0 %vm66_vm0, %v4910_v31  ;;  %4001 = vmatpush3.xpose.msk.msra.mxu1 %vm66_vm0, %v2791_v5 }
0x187f   :  { %4002 = vmatprep.subr.msk.mxu1 %vm66_vm0, %v3980_v55 }
0x1882   :  { %4003 = vmatpush3.xpose.msk.msra.mxu1 %vm66_vm0, %v3980_v55 }
0x1883   :  { %4004 = vmatprep.subr.msk.mxu1 %vm66_vm0, %v2781_v60 }
0x1886   :  { %4005 = vmatpush3.xpose.msk.msra.mxu1 %vm66_vm0, %v2781_v60 }
0x1887   :  { %4031 = vmatprep.subr.mxu1 %v4193_v21 }
0x1932   :  { %v3969_v50 = vpop.f32.mrf.mxu0 }
0x1934   :  { %v2678_v33 = vpop.f32.mrf.mxu0 }
0x1935   :  { %4006 = vmatprep.mubr.msk.f32.mxu1 %vm66_vm0, %v2678_v33 }
0x1936   :  { %4007 = vmatmul.mubr.msk.f32.vlgmr.msra.gmra.mxu1 %vm66_vm0, %v3969_v50 }
0x1937   :  { %4039 = vmatprep.mubr.msk.f32.mxu1 %vm4194_vm3, %v4193_v21 }
0x193a   :  { %v3994_v41 = vpop.f32.mrf.mxu0 }
0x193c   :  { %v2878_v10 = vpop.f32.mrf.mxu0 }
0x193e   :  { %v3997_v61 = vpop.f32.mrf.mxu0 }
0x193f   :  { %4009 = vmatprep.subr.mxu0 %v3997_v61 }
0x1940   :  { %v2888_v2 = vpop.f32.mrf.mxu0  ;;  %4010 = vmatpush3.msra.mxu0 %v3997_v61 }
0x1941   :  { %4011 = vmatprep.subr.mxu0 %v2888_v2 }
0x1942   :  { %4012 = vmatpush3.msra.mxu0 %v2888_v2 }
0x1943   :  { %4013 = vmatprep.subr.mxu0 %v3994_v41 }
0x1944   :  { %4014 = vmatpush3.msra.mxu0 %v3994_v41 }
0x1945   :  { %4015 = vmatprep.subr.mxu0 %v2878_v10 }
0x1946   :  { %4016 = vmatpush3.msra.mxu0 %v2878_v10 }
0x1947   :  { %4020 = vmatprep.subr.mxu0 %v2449_v20 }
0x19f6   :  { %v4008_v22 = vpop.f32.mrf.mxu1 }
0x19f7   :  { %v2991_v57 = vmul.f32 0.17677669, %v4008_v22 }
0x19f8   :  { %v2981_v16 = vpop.f32.mrf.mxu1 }
0x19f9   :  { %v2993_v8 = vadd.f32 %v2991_v57, %v35_v62  ;;  %v2990_v9 = vmul.f32 0.17677669, %v2981_v16 }
0x19fb   :  { %v2992_v14 = vadd.f32 %v2990_v9, %v34_v63  ;;  %v2997_v29 = vsel %vm66_vm0, %v2993_v8, -inf }
0x19fc   :  { %2998 = vmax.xlane.f32.xlu1 %v2997_v29 }
0x19fd   :  { %v2994_v11 = vsel %vm66_vm0, %v2992_v14, -inf }
0x19fe   :  { %2995 = vmax.xlane.f32.xlu0 %v2994_v11 }
0x1a0d   :  { %3188 = vrot.lane.b32.xlu1 %v4856_v34, %s4191_s8 }
0x1a11   :  { %3184 = vrot.lane.b32.xlu1 %v4869_v42, %s4191_s8 }
0x1a15   :  { %3182 = vrot.lane.b32.xlu1 %v4876_v17, %s4191_s8 }
0x1a85   :  { %v2999_v13 = vpop.xlane.xlu1 %2998 }
0x1a86   :  { %v3001_v6 = vsub.f32 %v2993_v8, %v2999_v13 }
0x1a87   :  { %v2996_v15 = vpop.xlane.xlu0 %2995 }
0x1a88   :  { %v3000_v7 = vsub.f32 %v2992_v14, %v2996_v15  ;;  %v3004_v0 = vmul.f32 1.442695, %v3001_v6 }
0x1a89   :  { %v3189_v42 = vpop.permute.xlu1 %3188 }
0x1a8a   :  { %v3002_v1 = vmul.f32 1.442695, %v3000_v7  ;;  %4032 = vmatpush3.msra.mxu1 %v3189_v42 }
0x1a8b   :  { %4033 = vmatprep.subr.mxu1 %v4193_v21 }
0x1a8c   :  { %4174 = vpow2.f32 %v3002_v1 }
0x1a8d   :  { %4176 = vpow2.f32 %v3004_v0  ;;  %v3185_v28 = vpop.permute.xlu1 %3184 }
0x1a91   :  { %v3183_v35 = vpop.permute.xlu1 %3182 }
0x1a99   :  { %v4175_v4 = vpop.eup %4174 }
0x1a9a   :  { %v3006_v24 = vsel %vm66_vm0, %v4175_v4, 0.0  ;;  %v4177_v25 = vpop.eup %4176 }
0x1a9b   :  { %3007 = vadd.xlane.f32.xlu0 %v3006_v24  ;;  %v3009_v34 = vsel %vm66_vm0, %v4177_v25, 0.0 }
0x1a9f   :  { %3010 = vadd.xlane.f32.xlu0 %v3009_v34 }
0x1ab5   :  { %3186 = vrot.lane.b32.xlu0 %v4863_v32, %s4191_s8 }
0x1b24   :  { %v3008_v17 = vpop.xlane.xlu0 %3007 }
0x1b25   :  { %4178 = vrcp.f32 %v3008_v17 }
0x1b28   :  { %v3011_v27 = vpop.xlane.xlu0 %3010 }
0x1b29   :  { %4180 = vrcp.f32 %v3011_v27 }
0x1b2c   :  { %v3187_v30 = vpop.permute.xlu0 %3186 }
0x1b2d   :  { %4034 = vmatpush3.msra.mxu1 %v3187_v30 }
0x1b2e   :  { %4035 = vmatprep.subr.mxu1 %v4193_v21 }
0x1b2f   :  { %4036 = vmatpush3.msra.mxu1 %v3185_v28 }
0x1b30   :  { %4037 = vmatprep.subr.mxu1 %v4193_v21 }
0x1b31   :  { %4038 = vmatpush3.msra.mxu1 %v3183_v35 }
0x1b32   :  { %v4179_v19 = vpop.eup %4178  ;;  %4040 = vmatmul.mubr.msk.f32.vlgmr.msra.gmra.mxu1 %vm66_vm0, %v4953_v47 }
0x1b33   :  { %v3013_v40 = vmul.f32 %v4179_v19, %v4175_v4 }
0x1b35   :  { %4017 = vmatprep.mubr.msk.f32.mxu0 %vm66_vm0, %v3013_v40 }
0x1b36   :  { %v4181_v32 = vpop.eup %4180 }
0x1b37   :  { %v3015_v43 = vmul.f32 %v4181_v32, %v4177_v25 }
0x1b39   :  { %4018 = vmatmul.mubr.msk.f32.vlgmr.msra.gmra.mxu0 %vm66_vm0, %v3015_v43 }
0x1b3a   :  { %4021 = vmatpush3.msra.mxu0 %v2449_v20 }
0x1b3b   :  { %4022 = vmatprep.subr.mxu0 %v2448_v44 }
0x1b3c   :  { %4023 = vmatpush3.msra.mxu0 %v2448_v44 }
0x1b3d   :  { %4024 = vmatprep.subr.mxu0 %v2447_v45 }
0x1b3e   :  { %4025 = vmatpush3.msra.mxu0 %v2447_v45 }
0x1b3f   :  { %4026 = vmatprep.subr.mxu0 %v2446_v48 }
0x1b40   :  { %4027 = vmatpush3.msra.mxu0 %v2446_v48 }
0x1b41   :  { %4042 = vmatprep.subr.mxu0 %v4193_v21 }
0x1bf2   :  { %v3263_v49 = vpop.f32.mrf.mxu1 }
0x1bf4   :  { %v4041_v52 = vpop.f32.mrf.mxu1 }
0x1bf9   :  { %v4019_v37 = vpop.f32.mrf.mxu0 }
0x1bfa   :  { %v3094_v46 = vadd.f32 %v4019_v37, %v4963_v56 }
0x1bfb   :  { %v3088_v3 = vpop.f32.mrf.mxu0 }
0x1bfc   :  { %v3089_v47 = vadd.f32 %v3088_v3, %v4961_v38 }
0x1bfe   :  { %4028 = vmatprep.mubr.msk.f32.mxu0 %vm66_vm0, %v3089_v47 }
0x1bff   :  { %4029 = vmatmul.mubr.msk.f32.vlgmr.msra.gmra.mxu0 %vm66_vm0, %v3094_v46 }
0x1c00   :  { %4043 = vmatpush3.xpose.msk.msra.mxu0 %vm66_vm0, %v4910_v31  ;;  %4050 = vmatprep.mubr.msk.f32.mxu0 %vm4194_vm3, %v4193_v21  ;;  %v3491_v31 = vld [vmem:[%s5065_s1 + $0x32] ss:$0 sm:$0xff] }
0x1c01   :  { %4044 = vmatprep.subr.mxu0 %v4193_v21 }
0x1c04   :  { %4045 = vmatpush3.xpose.msk.msra.mxu0 %vm66_vm0, %v4913_v18 }
0x1c05   :  { %4046 = vmatprep.subr.mxu0 %v4193_v21 }
0x1c08   :  { %4047 = vmatpush3.xpose.msk.msra.mxu0 %vm66_vm0, %v4917_v54 }
0x1c09   :  { %4048 = vmatprep.subr.mxu0 %v4193_v21  ;;  %v36_v21 = vld [vmem:[%s5065_s1 + $0x30] sm:$0x3] }
0x1c0c   :  { %4049 = vmatpush3.xpose.msk.msra.mxu0 %vm66_vm0, %v4921_v12 }
0x1c0f   :  { %4051 = vmatmul.mubr.msk.f32.vlgmr.msra.gmra.mxu0 %vm66_vm0, %v3263_v49 }
0x1cbf   :  { %v4030_v23 = vpop.f32.mrf.mxu0 }
0x1cc0   :  { %v3179_v53 = vadd.f32 %v4030_v23, %v3491_v31 }
0x1cc1   :  { %v3173_v36 = vpop.f32.mrf.mxu0 }
0x1cc2   :  { %3344 = vst [vmem:[%s5069_s7 + $0x8] sm:$0xff] %v3179_v53  ;;  %v3174_v18 = vadd.f32 %v3491_v31, %v3173_v36 }
0x1cc4   :  { %3343 = vst [vmem:[%s5069_s7] sm:$0xff] %v3174_v18 }
0x1ccf   :  { %v3336_v54 = vpop.f32.mrf.mxu0 }
0x1cd0   :  { %v3337_v12 = vadd.f32 %v3336_v54, %v36_v21 }
0x1cd1   :  { %v4052_v39 = vpop.f32.mrf.mxu0 }
0x1cd2   :  { %v3340_v38 = vsel %vm66_vm0, %v3337_v12, 0.0 }
0x1cd3   :  { %v3342_v59 = vsel %vm3341_vm4, %v3340_v38, 0.0 }
0x1cd4   :  { %3345 = vst [vmem:[%s5069_s7 + $0x10] sm:$0xff] %v3342_v59 }

</bundles_post_ra>
